<compile_context>
chip_gen: v5e
topology: v5e:2x2
jax: 0.10.0
libtpu: 0.0.40
codegen_flags: <defaults>
</compile_context>

<pallas_src>
import jax
import jax.numpy as jnp
from jax.experimental import pallas as pl
from jax.experimental.pallas import tpu as pltpu

F_IN = 28 * 28              # 784
H1, H2, H3 = 512, 256, 128
F_OUT = 10
_LANES = 128
F_IN_LANE_PAD = ((F_IN + _LANES - 1) // _LANES) * _LANES   # 896 (VMEM layout)
_SMALL_BATCH = 256          # single-tile fast path threshold


def mlp_kernel(x_ref,
               w1_ref, b1_ref,
               w2_ref, b2_ref,
               w3_ref, b3_ref,
               w4_ref, b4_ref,
               o_ref):
    # bf16 operands into the MXU, f32 accumulation; elementwise math in f32.
    x = x_ref[...].astype(jnp.bfloat16)

    h = jnp.dot(x, w1_ref[...], preferred_element_type=jnp.float32)
    h = jnp.maximum(h + b1_ref[...], 0.0)

    h = jnp.dot(h.astype(jnp.bfloat16), w2_ref[...],
                preferred_element_type=jnp.float32)
    h = jnp.maximum(h + b2_ref[...], 0.0)

    h = jnp.dot(h.astype(jnp.bfloat16), w3_ref[...],
                preferred_element_type=jnp.float32)
    h = jnp.maximum(h + b3_ref[...], 0.0)

    h = jnp.dot(h.astype(jnp.bfloat16), w4_ref[...],
                preferred_element_type=jnp.float32)
    o_ref[...] = (h + b4_ref[...]).astype(o_ref.dtype)


def _round_up(a, m):
    return (a + m - 1) // m * m


def pack_params(params):
    """One-time packing: bf16 (in_features, out_features) weights, f32 (1, out) biases.

    Call once at init; pass the result to net_forward on every call so the
    forward path never re-touches weight bytes in XLA.
    """
    return tuple((jnp.asarray(w, jnp.bfloat16),
                  jnp.asarray(b, jnp.float32).reshape(1, -1))
                 for (w, b) in params)


def net_forward(x, packed_params, *, batch_tile=1024):
    """x: (B, 1, 28, 28) or (B, 784).  Returns (B, 10) float32."""
    (w1, b1), (w2, b2), (w3, b3), (w4, b4) = packed_params

    B = x.shape[0]
    x_flat = x.reshape(B, F_IN)
    if x_flat.dtype not in (jnp.float32, jnp.bfloat16):
        x_flat = x_flat.astype(jnp.float32)
    x_bytes = x_flat.dtype.itemsize

    # ---- batch tiling -------------------------------------------------------
    if B <= _SMALL_BATCH:
        TB, B_pad = B, B                           # single tile, no padding
    else:
        n_tiles = max(pl.cdiv(B, batch_tile), 2)   # >=2 steps: both v7x TCs busy
        TB = _round_up(pl.cdiv(B, n_tiles), 8)     # adaptive: <=8 pad rows/tile
        B_pad = _round_up(B, TB)
    if B_pad != B:
        x_flat = jnp.pad(x_flat, ((0, B_pad - B), (0, 0)))
    grid = (B_pad // TB,)

    def const_spec(arr):
        # Constant block index across the grid -> DMA'd once, stays resident.
        # (Could additionally be single-buffered via pipeline_mode; VMEM is not
        #  the binding constraint at these tile sizes, so we keep the default.)
        return pl.BlockSpec(arr.shape, lambda i: (0, 0))

    # Rough VMEM budget (double-buffered x/out tiles, f32 intermediates,
    # resident weights + headroom); clamp under v7x's 64 MiB physical VMEM.
    vmem_est = (2 * TB * F_IN_LANE_PAD * x_bytes
                + 2 * TB * _LANES * 4
                + 4 * TB * H1 * 4
                + (6 << 20))
    vmem_limit = int(min(max(vmem_est, 32 << 20), 56 << 20))

    flops = 2 * B_pad * (F_IN * H1 + H1 * H2 + H2 * H3 + H3 * F_OUT)
    bytes_accessed = (
        B_pad * F_IN * x_bytes
        + sum(a.size * a.dtype.itemsize
              for a in (w1, b1, w2, b2, w3, b3, w4, b4))
        + B_pad * F_OUT * 4)

    out = pl.pallas_call(
        mlp_kernel,
        out_shape=jax.ShapeDtypeStruct((B_pad, F_OUT), jnp.float32),
        grid=grid,
        in_specs=[
            pl.BlockSpec((TB, F_IN), lambda i: (i, 0)),   # streamed x tile
            const_spec(w1), const_spec(b1),
            const_spec(w2), const_spec(b2),
            const_spec(w3), const_spec(b3),
            const_spec(w4), const_spec(b4),
        ],
        out_specs=pl.BlockSpec((TB, F_OUT), lambda i: (i, 0)),
        compiler_params=pltpu.CompilerParams(
            dimension_semantics=("parallel",),
            vmem_limit_bytes=vmem_limit,
        ),
        cost_estimate=pl.CostEstimate(
            flops=flops, transcendentals=0, bytes_accessed=bytes_accessed),
    )(x_flat, w1, b1, w2, b2, w3, b3, w4, b4)

    return out if B_pad == B else out[:B]


def init_params(key):
    """Deterministic synthetic parameters matching the PyTorch module's shapes."""
    dims = [(F_IN, H1), (H1, H2), (H2, H3), (H3, F_OUT)]
    params = []
    for i, (fan_in, fan_out) in enumerate(dims):
        kw, kb = jax.random.split(jax.random.fold_in(key, i))
        bound = 1.0 / jnp.sqrt(fan_in)  # same scale as PyTorch default init
        w = jax.random.uniform(kw, (fan_in, fan_out), jnp.float32, -bound, bound)
        b = jax.random.uniform(kb, (1, fan_out), jnp.float32, -bound, bound)
        params.append((w, b))
    return params


def reference_forward(x, params):
    h = x.reshape(x.shape[0], -1).astype(jnp.float32)
    for i, (w, b) in enumerate(params):
        h = h @ w + b.reshape(1, -1)
        if i < 3:
            h = jnp.maximum(h, 0.0)
    return h


if __name__ == "__main__":
    key = jax.random.PRNGKey(0)
    k_x, k_p = jax.random.split(key)

    params = init_params(k_p)
    packed = pack_params(params)          # one-time packing, off the hot path

    fwd = jax.jit(net_forward)

    # 1) Small-batch fast path (single tile, no padding, no slice).
    B = 8
    x = jax.random.normal(k_x, (B, 1, 28, 28), dtype=jnp.float32)  # NCHW
    out = jax.block_until_ready(fwd(x, packed))
    assert out.shape == (B, F_OUT), out.shape
    assert out.dtype == jnp.float32, out.dtype
    ref = reference_forward(x, params)
    assert jnp.allclose(out, ref, atol=5e-2, rtol=5e-2), \
        float(jnp.max(jnp.abs(out - ref)))

    # 2) Tiled / padded path (grid > 1, batch padding sliced off).
    B2 = 300
    x2 = jax.random.normal(jax.random.fold_in(k_x, 1), (B2, 1, 28, 28),
                           dtype=jnp.float32)
    out2 = jax.block_until_ready(net_forward(x2, packed, batch_tile=128))
    assert out2.shape == (B2, F_OUT), out2.shape
    ref2 = reference_forward(x2, params)
    assert jnp.allclose(out2, ref2, atol=5e-2, rtol=5e-2), \
        float(jnp.max(jnp.abs(out2 - ref2)))

    print("KERNEL_OK")
</pallas_src>

<mosaic_0001>
module attributes {stable_mosaic.version = 11 : i64} {
  func.func @mlp_kernel(%arg0: i32, %arg1: memref<8x784xf32, #tpu.memory_space<vmem>>, %arg2: memref<784x512xbf16, #tpu.memory_space<vmem>>, %arg3: memref<1x512xf32, #tpu.memory_space<vmem>>, %arg4: memref<512x256xbf16, #tpu.memory_space<vmem>>, %arg5: memref<1x256xf32, #tpu.memory_space<vmem>>, %arg6: memref<256x128xbf16, #tpu.memory_space<vmem>>, %arg7: memref<1x128xf32, #tpu.memory_space<vmem>>, %arg8: memref<128x10xbf16, #tpu.memory_space<vmem>>, %arg9: memref<1x10xf32, #tpu.memory_space<vmem>>, %arg10: memref<8x10xf32, #tpu.memory_space<vmem>>) attributes {dimension_semantics = [#tpu.dimension_semantics<parallel>], iteration_bounds = array<i64: 1>, scalar_prefetch = 0 : i64, scratch_operands = 0 : i64, tpu.core_type = #tpu.core_type<tc>, window_params = [{transform_indices = @transform_0, window_bounds = array<i64: 8, 784>}, {pipeline_mode = #tpu.pipeline_mode<synchronous>, transform_indices = @transform_1, window_bounds = array<i64: 784, 512>}, {pipeline_mode = #tpu.pipeline_mode<synchronous>, transform_indices = @transform_2, window_bounds = array<i64: 1, 512>}, {pipeline_mode = #tpu.pipeline_mode<synchronous>, transform_indices = @transform_3, window_bounds = array<i64: 512, 256>}, {pipeline_mode = #tpu.pipeline_mode<synchronous>, transform_indices = @transform_4, window_bounds = array<i64: 1, 256>}, {pipeline_mode = #tpu.pipeline_mode<synchronous>, transform_indices = @transform_5, window_bounds = array<i64: 256, 128>}, {pipeline_mode = #tpu.pipeline_mode<synchronous>, transform_indices = @transform_6, window_bounds = array<i64: 1, 128>}, {pipeline_mode = #tpu.pipeline_mode<synchronous>, transform_indices = @transform_7, window_bounds = array<i64: 128, 10>}, {pipeline_mode = #tpu.pipeline_mode<synchronous>, transform_indices = @transform_8, window_bounds = array<i64: 1, 10>}, {transform_indices = @transform_9, window_bounds = array<i64: 8, 10>}]} {
    %c0 = arith.constant 0 : index
    %c0_0 = arith.constant 0 : index
    %0 = vector.load %arg1[%c0, %c0_0] : memref<8x784xf32, #tpu.memory_space<vmem>>, vector<8x784xf32>
    %1 = arith.truncf %0 : vector<8x784xf32> to vector<8x784xbf16>
    %c0_1 = arith.constant 0 : index
    %c0_2 = arith.constant 0 : index
    %2 = vector.load %arg2[%c0_1, %c0_2] : memref<784x512xbf16, #tpu.memory_space<vmem>>, vector<784x512xbf16>
    %cst = arith.constant dense<0.000000e+00> : vector<8x512xf32>
    %3 = tpu.matmul %1, %2, %cst {dimension_numbers = #tpu.dot_dimension_numbers<[1], [0], [0], [1], [0, 0, 1, 1], [], []>} : vector<8x784xbf16>, vector<784x512xbf16>, vector<8x512xf32> -> vector<8x512xf32>
    %c0_3 = arith.constant 0 : index
    %c0_4 = arith.constant 0 : index
    %4 = vector.load %arg3[%c0_3, %c0_4] : memref<1x512xf32, #tpu.memory_space<vmem>>, vector<1x512xf32>
    %5 = vector.broadcast %4 : vector<1x512xf32> to vector<8x512xf32>
    %6 = arith.addf %3, %5 : vector<8x512xf32>
    %cst_5 = arith.constant 0.000000e+00 : f32
    %7 = vector.broadcast %cst_5 : f32 to vector<8x512xf32>
    %8 = arith.maximumf %6, %7 : vector<8x512xf32>
    %9 = arith.truncf %8 : vector<8x512xf32> to vector<8x512xbf16>
    %c0_6 = arith.constant 0 : index
    %c0_7 = arith.constant 0 : index
    %10 = vector.load %arg4[%c0_6, %c0_7] : memref<512x256xbf16, #tpu.memory_space<vmem>>, vector<512x256xbf16>
    %cst_8 = arith.constant dense<0.000000e+00> : vector<8x256xf32>
    %11 = tpu.matmul %9, %10, %cst_8 {dimension_numbers = #tpu.dot_dimension_numbers<[1], [0], [0], [1], [0, 0, 1, 1], [], []>} : vector<8x512xbf16>, vector<512x256xbf16>, vector<8x256xf32> -> vector<8x256xf32>
    %c0_9 = arith.constant 0 : index
    %c0_10 = arith.constant 0 : index
    %12 = vector.load %arg5[%c0_9, %c0_10] : memref<1x256xf32, #tpu.memory_space<vmem>>, vector<1x256xf32>
    %13 = vector.broadcast %12 : vector<1x256xf32> to vector<8x256xf32>
    %14 = arith.addf %11, %13 : vector<8x256xf32>
    %cst_11 = arith.constant 0.000000e+00 : f32
    %15 = vector.broadcast %cst_11 : f32 to vector<8x256xf32>
    %16 = arith.maximumf %14, %15 : vector<8x256xf32>
    %17 = arith.truncf %16 : vector<8x256xf32> to vector<8x256xbf16>
    %c0_12 = arith.constant 0 : index
    %c0_13 = arith.constant 0 : index
    %18 = vector.load %arg6[%c0_12, %c0_13] : memref<256x128xbf16, #tpu.memory_space<vmem>>, vector<256x128xbf16>
    %cst_14 = arith.constant dense<0.000000e+00> : vector<8x128xf32>
    %19 = tpu.matmul %17, %18, %cst_14 {dimension_numbers = #tpu.dot_dimension_numbers<[1], [0], [0], [1], [0, 0, 1, 1], [], []>} : vector<8x256xbf16>, vector<256x128xbf16>, vector<8x128xf32> -> vector<8x128xf32>
    %c0_15 = arith.constant 0 : index
    %c0_16 = arith.constant 0 : index
    %20 = vector.load %arg7[%c0_15, %c0_16] : memref<1x128xf32, #tpu.memory_space<vmem>>, vector<1x128xf32>
    %21 = vector.broadcast %20 : vector<1x128xf32> to vector<8x128xf32>
    %22 = arith.addf %19, %21 : vector<8x128xf32>
    %cst_17 = arith.constant 0.000000e+00 : f32
    %23 = vector.broadcast %cst_17 : f32 to vector<8x128xf32>
    %24 = arith.maximumf %22, %23 : vector<8x128xf32>
    %25 = arith.truncf %24 : vector<8x128xf32> to vector<8x128xbf16>
    %c0_18 = arith.constant 0 : index
    %c0_19 = arith.constant 0 : index
    %26 = vector.load %arg8[%c0_18, %c0_19] : memref<128x10xbf16, #tpu.memory_space<vmem>>, vector<128x10xbf16>
    %cst_20 = arith.constant dense<0.000000e+00> : vector<8x10xf32>
    %27 = tpu.matmul %25, %26, %cst_20 {dimension_numbers = #tpu.dot_dimension_numbers<[1], [0], [0], [1], [0, 0, 1, 1], [], []>} : vector<8x128xbf16>, vector<128x10xbf16>, vector<8x10xf32> -> vector<8x10xf32>
    %c0_21 = arith.constant 0 : index
    %c0_22 = arith.constant 0 : index
    %28 = vector.load %arg9[%c0_21, %c0_22] : memref<1x10xf32, #tpu.memory_space<vmem>>, vector<1x10xf32>
    %29 = vector.broadcast %28 : vector<1x10xf32> to vector<8x10xf32>
    %30 = arith.addf %27, %29 : vector<8x10xf32>
    %c0_23 = arith.constant 0 : index
    %c0_24 = arith.constant 0 : index
    %31 = vector.load %arg10[%c0_23, %c0_24] : memref<8x10xf32, #tpu.memory_space<vmem>>, vector<8x10xf32>
    tpu.vector_store %arg10[%c0_23, %c0_24], %30 {strides = array<i32>} : memref<8x10xf32, #tpu.memory_space<vmem>>, vector<8x10xf32>,
    return
  }
  func.func @transform_0(%arg0: i32) -> (i32, i32) {
    %c0_i32 = arith.constant 0 : i32
    %c0_i32_0 = arith.constant 0 : i32
    return %arg0, %c0_i32 : i32, i32
  }
  func.func @transform_1(%arg0: i32) -> (i32, i32) {
    %c0_i32 = arith.constant 0 : i32
    %c0_i32_0 = arith.constant 0 : i32
    %c0_i32_1 = arith.constant 0 : i32
    return %c0_i32, %c0_i32_0 : i32, i32
  }
  func.func @transform_2(%arg0: i32) -> (i32, i32) {
    %c0_i32 = arith.constant 0 : i32
    %c0_i32_0 = arith.constant 0 : i32
    %c0_i32_1 = arith.constant 0 : i32
    return %c0_i32, %c0_i32_0 : i32, i32
  }
  func.func @transform_3(%arg0: i32) -> (i32, i32) {
    %c0_i32 = arith.constant 0 : i32
    %c0_i32_0 = arith.constant 0 : i32
    %c0_i32_1 = arith.constant 0 : i32
    return %c0_i32, %c0_i32_0 : i32, i32
  }
  func.func @transform_4(%arg0: i32) -> (i32, i32) {
    %c0_i32 = arith.constant 0 : i32
    %c0_i32_0 = arith.constant 0 : i32
    %c0_i32_1 = arith.constant 0 : i32
    return %c0_i32, %c0_i32_0 : i32, i32
  }
  func.func @transform_5(%arg0: i32) -> (i32, i32) {
    %c0_i32 = arith.constant 0 : i32
    %c0_i32_0 = arith.constant 0 : i32
    %c0_i32_1 = arith.constant 0 : i32
    return %c0_i32, %c0_i32_0 : i32, i32
  }
  func.func @transform_6(%arg0: i32) -> (i32, i32) {
    %c0_i32 = arith.constant 0 : i32
    %c0_i32_0 = arith.constant 0 : i32
    %c0_i32_1 = arith.constant 0 : i32
    return %c0_i32, %c0_i32_0 : i32, i32
  }
  func.func @transform_7(%arg0: i32) -> (i32, i32) {
    %c0_i32 = arith.constant 0 : i32
    %c0_i32_0 = arith.constant 0 : i32
    %c0_i32_1 = arith.constant 0 : i32
    return %c0_i32, %c0_i32_0 : i32, i32
  }
  func.func @transform_8(%arg0: i32) -> (i32, i32) {
    %c0_i32 = arith.constant 0 : i32
    %c0_i32_0 = arith.constant 0 : i32
    %c0_i32_1 = arith.constant 0 : i32
    return %c0_i32, %c0_i32_0 : i32, i32
  }
  func.func @transform_9(%arg0: i32) -> (i32, i32) {
    %c0_i32 = arith.constant 0 : i32
    %c0_i32_0 = arith.constant 0 : i32
    return %arg0, %c0_i32 : i32, i32
  }
}

</mosaic_0001>

<bundles_post_ra>
// kernel: net_forward.1
= control target key start
LH: loop header
LB: loop body
LE: loop exit
PB: predicated region body
PF: predicated region fallthrough
CT: control target
= control target key end

     0   :  { %14 = vsyncpa [#allocation3], 0  ;;  %s4486_s0 = inlined_call_operand.vmem [shape: f32[8,784], index: 0, kind: input, shape index: {}]   ;;  %s4487_s1 = inlined_call_operand.hbm [shape: bf16[784,512], index: 1, kind: input, shape index: {}]   ;;  %s4488_s2 = inlined_call_operand.vmem [shape: f32[1,512], index: 2, kind: input, shape index: {}]   ;;  %s4489_s3 = inlined_call_operand.vmem [shape: bf16[512,256], index: 3, kind: input, shape index: {}]   ;;  %s4490_s4 = inlined_call_operand.vmem [shape: f32[1,256], index: 4, kind: input, shape index: {}]   ;;  %s4491_s5 = inlined_call_operand.vmem [shape: bf16[256,128], index: 5, kind: input, shape index: {}]   ;;  %s4492_s6 = inlined_call_operand.vmem [shape: f32[1,128], index: 6, kind: input, shape index: {}]   ;;  %s4493_s7 = inlined_call_operand.vmem [shape: bf16[128,10], index: 7, kind: input, shape index: {}]   ;;  %s4494_s8 = inlined_call_operand.vmem [shape: f32[1,10], index: 8, kind: input, shape index: {}]   ;;  %s4495_s9 = inlined_call_operand.hbm [shape: f32[8,10], index: 9, kind: output, shape index: {}]  }
   0x1   :  { %15 = vsyncpa [#allocation4], 0  ;;  %s22_s11 = sshll.u32 %s4487_s1, 4  ;;  %s3866_s12 = smov [#allocation2]   ;;  %s23_s11 = int_to_ptr.hbm [resolvable:$true] %s22_s11 }
   0x2   :  { %s24_s13 = sshll.u32 %s3866_s12, 4  ;;  %s3867_s14 = smov 256   ;;  %s25_s13 = int_to_ptr.vmem [resolvable:$true] %s24_s13 }
   0x3   :  { %s3868_s15 = smov 16  }
   0x4   :  { %30 = dma.hbm_to_vmem [thread:$0]  %s23_s11, 25088, %s25_s13, [#allocation3], %s3867_s14, %s3867_s14, %s3868_s15  }
   0x5   :  { %3862 = dma.done.wait [#allocation3], 25088  }
   0x6   :  { %3863 = vsyncadd [#allocation3], 4294942208  ;;  %v2498_v0 = vld [vmem:[#allocation2 + $0xe0] sm:$0xf]  ;;  %v3554_v1 = vld [vmem:[#allocation2 + $0xec] sm:$0xf0] }
   0x7   :  { %v2626_v2 = vld [vmem:[#allocation2 + $0x1e0] sm:$0xf]  ;;  %v2499_v3 = vor.u32 %v3554_v1, %v2498_v0  ;;  %v3586_v4 = vld [vmem:[#allocation2 + $0x1ec] sm:$0xf0]  ;;  %vm1250_vm0 = vcmask 130048   ;;  %s3869_s23 = smov [#allocation5]  }
   0x8   :  { %v2754_v5 = vld [vmem:[#allocation2 + $0x2e0] sm:$0xf]  ;;  %v3618_v6 = vld [vmem:[#allocation2 + $0x2ec] sm:$0xf0]  ;;  %v2627_v7 = vor.u32 %v3586_v4, %v2626_v2  ;;  %s2374_s26 = sshll.u32 %s4495_s9, 4  ;;  %vm2365_vm1 = vcmask 80896   ;;  %s2375_s26 = int_to_ptr.hbm [resolvable:$true] %s2374_s26 }
   0x9   :  { %v2755_v8 = vor.u32 %v3618_v6, %v2754_v5  ;;  %v2882_v9 = vld [vmem:[#allocation2 + $0x3e0] sm:$0xf]  ;;  %v3650_v10 = vld [vmem:[#allocation2 + $0x3ec] sm:$0xf0]  ;;  %1254 = vmatpush.bf16.msra.mxu0 %v2499_v3 }
   0xa   :  { %v2482_v11 = vld [vmem:[#allocation2 + $0xc0] sm:$0xf]  ;;  %v2883_v12 = vor.u32 %v3650_v10, %v2882_v9  ;;  %v3550_v13 = vld [vmem:[#allocation2 + $0xcc] sm:$0xf0]  ;;  %1267 = vmatpush.bf16.msra.mxu1 %v2627_v7 }
   0xb   :  { %v2610_v14 = vld [vmem:[#allocation2 + $0x1c0] sm:$0xf]  ;;  %v3582_v15 = vld [vmem:[#allocation2 + $0x1cc] sm:$0xf0]  ;;  %1280 = vmatpush.bf16.msra.mxu2 %v2755_v8  ;;  %v2483_v16 = vor.u32 %v3550_v13, %v2482_v11 }
   0xc   :  { %v2611_v17 = vor.u32 %v3582_v15, %v2610_v14  ;;  %v2738_v18 = vld [vmem:[#allocation2 + $0x2c0] sm:$0xf]  ;;  %v3614_v19 = vld [vmem:[#allocation2 + $0x2cc] sm:$0xf0]  ;;  %1293 = vmatpush.bf16.msra.mxu3 %v2883_v12 }
   0xd   :  { %v2866_v20 = vld [vmem:[#allocation2 + $0x3c0] sm:$0xf]  ;;  %v2739_v21 = vor.u32 %v3614_v19, %v2738_v18  ;;  %v3646_v22 = vld [vmem:[#allocation2 + $0x3cc] sm:$0xf0]  ;;  %1255 = vmatpush.bf16.msra.mxu0 %v2483_v16 }
   0xe   :  { %v2466_v23 = vld [vmem:[#allocation2 + $0xa0] sm:$0xf]  ;;  %v3546_v24 = vld [vmem:[#allocation2 + $0xac] sm:$0xf0]  ;;  %v2867_v25 = vor.u32 %v3646_v22, %v2866_v20  ;;  %1268 = vmatpush.bf16.msra.mxu1 %v2611_v17 }
   0xf   :  { %v2594_v26 = vld [vmem:[#allocation2 + $0x1a0] sm:$0xf]  ;;  %v3578_v27 = vld [vmem:[#allocation2 + $0x1ac] sm:$0xf0]  ;;  %v2467_v29 = vor.u32 %v3546_v24, %v2466_v23  ;;  %1281 = vmatpush.bf16.msra.mxu2 %v2739_v21 }
  0x10   :  { %v2722_v28 = vld [vmem:[#allocation2 + $0x2a0] sm:$0xf]  ;;  %v3610_v30 = vld [vmem:[#allocation2 + $0x2ac] sm:$0xf0]  ;;  %v2595_v33 = vor.u32 %v3578_v27, %v2594_v26  ;;  %1294 = vmatpush.bf16.msra.mxu3 %v2867_v25 }
  0x11   :  { %v2850_v31 = vld [vmem:[#allocation2 + $0x3a0] sm:$0xf]  ;;  %v3642_v32 = vld [vmem:[#allocation2 + $0x3ac] sm:$0xf0]  ;;  %v2723_v34 = vor.u32 %v3610_v30, %v2722_v28  ;;  %1256 = vmatpush.bf16.msra.mxu0 %v2467_v29 }
  0x12   :  { %v2450_v35 = vld [vmem:[#allocation2 + $0x80] sm:$0xf]  ;;  %v3542_v36 = vld [vmem:[#allocation2 + $0x8c] sm:$0xf0]  ;;  %v2851_v38 = vor.u32 %v3642_v32, %v2850_v31  ;;  %1269 = vmatpush.bf16.msra.mxu1 %v2595_v33  ;;  %v3552_v33 = vld [vmem:[#allocation2 + $0xe4] sm:$0xf] }
  0x13   :  { %v2578_v37 = vld [vmem:[#allocation2 + $0x180] sm:$0xf]  ;;  %v3574_v39 = vld [vmem:[#allocation2 + $0x18c] sm:$0xf0]  ;;  %v2451_v44 = vor.u32 %v3542_v36, %v2450_v35  ;;  %1282 = vmatpush.bf16.msra.mxu2 %v2723_v34  ;;  %v2500_v34 = vld [vmem:[#allocation2 + $0xf0] sm:$0xf0] }
  0x14   :  { %v2706_v40 = vld [vmem:[#allocation2 + $0x280] sm:$0xf]  ;;  %v3606_v41 = vld [vmem:[#allocation2 + $0x28c] sm:$0xf0]  ;;  %v2579_v45 = vor.u32 %v3574_v39, %v2578_v37  ;;  %1295 = vmatpush.bf16.msra.mxu3 %v2851_v38 }
  0x15   :  { %v2834_v42 = vld [vmem:[#allocation2 + $0x380] sm:$0xf]  ;;  %v3638_v43 = vld [vmem:[#allocation2 + $0x38c] sm:$0xf0]  ;;  %v2707_v46 = vor.u32 %v3606_v41, %v2706_v40  ;;  %1257 = vmatpush.bf16.msra.mxu0 %v2451_v44  ;;  %v2628_v44 = vld [vmem:[#allocation2 + $0x1f0] sm:$0xf0] }
  0x16   :  { %v2434_v47 = vld [vmem:[#allocation2 + $0x60] sm:$0xf]  ;;  %v3538_v48 = vld [vmem:[#allocation2 + $0x6c] sm:$0xf0]  ;;  %v2835_v50 = vor.u32 %v3638_v43, %v2834_v42  ;;  %1270 = vmatpush.bf16.msra.mxu1 %v2579_v45  ;;  %v3584_v43 = vld [vmem:[#allocation2 + $0x1e4] sm:$0xf] }
  0x17   :  { %v2562_v49 = vld [vmem:[#allocation2 + $0x160] sm:$0xf]  ;;  %v3570_v51 = vld [vmem:[#allocation2 + $0x16c] sm:$0xf0]  ;;  %v2435_v56 = vor.u32 %v3538_v48, %v2434_v47  ;;  %1283 = vmatpush.bf16.msra.mxu2 %v2707_v46  ;;  %v53_v45 = vld [vmem:[%s4486_s0 + $0x18] sm:$0xff]  ;;  %v2503_v47 = vor.u32 %v3552_v33, %v2500_v34 }
  0x18   :  { %v2690_v52 = vld [vmem:[#allocation2 + $0x260] sm:$0xf]  ;;  %v3602_v53 = vld [vmem:[#allocation2 + $0x26c] sm:$0xf0]  ;;  %v2563_v57 = vor.u32 %v3570_v51, %v2562_v49  ;;  %1296 = vmatpush.bf16.msra.mxu3 %v2835_v50 }
  0x19   :  { %v2818_v54 = vld [vmem:[#allocation2 + $0x360] sm:$0xf]  ;;  %v3634_v55 = vld [vmem:[#allocation2 + $0x36c] sm:$0xf0]  ;;  %v2691_v58 = vor.u32 %v3602_v53, %v2690_v52  ;;  %1258 = vmatpush.bf16.msra.mxu0 %v2435_v56  ;;  %v3548_v53 = vld [vmem:[#allocation2 + $0xc4] sm:$0xf] }
  0x1a   :  { %v2418_v59 = vld [vmem:[#allocation2 + $0x40] sm:$0xf]  ;;  %v3534_v60 = vld [vmem:[#allocation2 + $0x4c] sm:$0xf0]  ;;  %v2819_v62 = vor.u32 %v3634_v55, %v2818_v54  ;;  %1271 = vmatpush.bf16.msra.mxu1 %v2563_v57  ;;  %v2484_v54 = vld [vmem:[#allocation2 + $0xd0] sm:$0xf0]  ;;  %v3936_v57 = vpack.c.bf16 %v53_v45, %v53_v45 }
  0x1b   :  { %v2546_v61 = vld [vmem:[#allocation2 + $0x140] sm:$0xf]  ;;  %v3566_v63 = vld [vmem:[#allocation2 + $0x14c] sm:$0xf0]  ;;  %v2419_v4 = vor.u32 %v3534_v60, %v2418_v59  ;;  %1284 = vmatpush.bf16.msra.mxu2 %v2691_v58  ;;  %v51_v58 = vld [vmem:[%s4486_s0 + $0x8] sm:$0xff]  ;;  %v2631_v59 = vor.u32 %v3584_v43, %v2628_v44 }
  0x1c   :  { %v2674_v0 = vld [vmem:[#allocation2 + $0x240] sm:$0xf]  ;;  %v3598_v1 = vld [vmem:[#allocation2 + $0x24c] sm:$0xf0]  ;;  %v2547_v5 = vor.u32 %v3566_v63, %v2546_v61  ;;  %1297 = vmatpush.bf16.msra.mxu3 %v2819_v62  ;;  %v3580_v61 = vld [vmem:[#allocation2 + $0x1c4] sm:$0xf] }
  0x1d   :  { %v2802_v2 = vld [vmem:[#allocation2 + $0x340] sm:$0xf]  ;;  %v3630_v3 = vld [vmem:[#allocation2 + $0x34c] sm:$0xf0]  ;;  %v2675_v6 = vor.u32 %v3598_v1, %v2674_v0  ;;  %1259 = vmatpush.bf16.msra.mxu0 %v2419_v4  ;;  %v2612_v62 = vld [vmem:[#allocation2 + $0x1d0] sm:$0xf0]  ;;  %v2487_v0 = vor.u32 %v3548_v53, %v2484_v54 }
  0x1e   :  { %v2402_v7 = vld [vmem:[#allocation2 + $0x20] sm:$0xf]  ;;  %v3530_v8 = vld [vmem:[#allocation2 + $0x2c] sm:$0xf0]  ;;  %v2803_v10 = vor.u32 %v3630_v3, %v2802_v2  ;;  %1272 = vmatpush.bf16.msra.mxu1 %v2547_v5  ;;  %v3544_v5 = vld [vmem:[#allocation2 + $0xa4] sm:$0xf] }
  0x1f   :  { %v2530_v9 = vld [vmem:[#allocation2 + $0x120] sm:$0xf]  ;;  %v3562_v11 = vld [vmem:[#allocation2 + $0x12c] sm:$0xf0]  ;;  %v2403_v16 = vor.u32 %v3530_v8, %v2402_v7  ;;  %1285 = vmatpush.bf16.msra.mxu2 %v2675_v6  ;;  %v2468_v6 = vld [vmem:[#allocation2 + $0xb0] sm:$0xf0]  ;;  %v3943_v7 = vpack.c.bf16 %v51_v58, %v51_v58  ;;  %v2615_v8 = vor.u32 %v3580_v61, %v2612_v62 }
  0x20   :  { %v2658_v12 = vld [vmem:[#allocation2 + $0x220] sm:$0xf]  ;;  %v3594_v13 = vld [vmem:[#allocation2 + $0x22c] sm:$0xf0]  ;;  %v2531_v20 = vor.u32 %v3562_v11, %v2530_v9  ;;  %1298 = vmatpush.bf16.msra.mxu3 %v2803_v10  ;;  %v3576_v10 = vld [vmem:[#allocation2 + $0x1a4] sm:$0xf] }
  0x21   :  { %v2786_v14 = vld [vmem:[#allocation2 + $0x320] sm:$0xf]  ;;  %v3626_v15 = vld [vmem:[#allocation2 + $0x32c] sm:$0xf0]  ;;  %v2659_v21 = vor.u32 %v3594_v13, %v2658_v12  ;;  %1260 = vmatpush.bf16.msra.mxu0 %v2403_v16  ;;  %v2596_v11 = vld [vmem:[#allocation2 + $0x1b0] sm:$0xf0]  ;;  %v2471_v13 = vor.u32 %v3544_v5, %v2468_v6 }
  0x22   :  { %v2386_v17 = vld [vmem:[#allocation2] sm:$0xf]  ;;  %v3526_v18 = vld [vmem:[#allocation2 + $0xc] sm:$0xf0]  ;;  %v2787_v25 = vor.u32 %v3626_v15, %v2786_v14  ;;  %1273 = vmatpush.bf16.msra.mxu1 %v2531_v20  ;;  %v2599_v20 = vor.u32 %v3576_v10, %v2596_v11  ;;  %v3532_v43 = vld [vmem:[#allocation2 + $0x44] sm:$0xf] }
  0x23   :  { %v2514_v19 = vld [vmem:[#allocation2 + $0x100] sm:$0xf]  ;;  %v3558_v22 = vld [vmem:[#allocation2 + $0x10c] sm:$0xf0]  ;;  %v2387_v32 = vor.u32 %v3526_v18, %v2386_v17  ;;  %1286 = vmatpush.bf16.msra.mxu2 %v2659_v21  ;;  %v3540_v18 = vld [vmem:[#allocation2 + $0x84] sm:$0xf] }
  0x24   :  { %v2642_v23 = vld [vmem:[#allocation2 + $0x200] sm:$0xf]  ;;  %v3590_v24 = vld [vmem:[#allocation2 + $0x20c] sm:$0xf0]  ;;  %v2515_v36 = vor.u32 %v3558_v22, %v2514_v19  ;;  %1299 = vmatpush.bf16.msra.mxu3 %v2787_v25  ;;  %v2452_v19 = vld [vmem:[#allocation2 + $0x90] sm:$0xf0] }
  0x25   :  { %v2770_v26 = vld [vmem:[#allocation2 + $0x300] sm:$0xf]  ;;  %v3622_v27 = vld [vmem:[#allocation2 + $0x30c] sm:$0xf0]  ;;  %v2643_v37 = vor.u32 %v3590_v24, %v2642_v23  ;;  %1261 = vmatpush.bf16.msra.mxu0 %v2387_v32  ;;  %v3572_v22 = vld [vmem:[#allocation2 + $0x184] sm:$0xf]  ;;  %v2455_v25 = vor.u32 %v3540_v18, %v2452_v19 }
  0x26   :  { %v3010_v28 = vld [vmem:[#allocation2 + $0x4e0] sm:$0xf]  ;;  %v3682_v29 = vld [vmem:[#allocation2 + $0x4ec] sm:$0xf0]  ;;  %v2771_v41 = vor.u32 %v3622_v27, %v2770_v26  ;;  %1274 = vmatpush.bf16.msra.mxu1 %v2515_v36  ;;  %v2580_v23 = vld [vmem:[#allocation2 + $0x190] sm:$0xf0] }
  0x27   :  { %v3138_v30 = vld [vmem:[#allocation2 + $0x5e0] sm:$0xf]  ;;  %v3714_v31 = vld [vmem:[#allocation2 + $0x5ec] sm:$0xf0]  ;;  %v3011_v42 = vor.u32 %v3682_v29, %v3010_v28  ;;  %1287 = vmatpush.bf16.msra.mxu2 %v2643_v37  ;;  %v2583_v33 = vor.u32 %v3572_v22, %v2580_v23  ;;  %v2564_v36 = vld [vmem:[#allocation2 + $0x170] sm:$0xf0] }
  0x28   :  { %v52_v35 = vld [vmem:[%s4486_s0 + $0x10] sm:$0xff]  ;;  %v3154_v38 = vld [vmem:[#allocation2 + $0x600] sm:$0xf]  ;;  %v3139_v46 = vor.u32 %v3714_v31, %v3138_v30  ;;  %1300 = vmatpush.bf16.msra.mxu3 %v2771_v41  ;;  %v3536_v30 = vld [vmem:[#allocation2 + $0x64] sm:$0xf] }
  0x29   :  { %v3718_v39 = vld [vmem:[#allocation2 + $0x60c] sm:$0xf0]  ;;  %v50_v40 = vld [vmem:[%s4486_s0] sm:$0xff]  ;;  %v3932_v51 = vpack.c.bf16 %v52_v35, %v52_v35  ;;  %1306 = vmatpush.bf16.msrb.mxu0 %v3011_v42  ;;  %1275 = vmatmul.bf16.vlgmr.msra.gmra.mxu1 %v3943_v7  ;;  %v2436_v31 = vld [vmem:[#allocation2 + $0x70] sm:$0xf0] }
  0x2a   :  { %v2994_v48 = vld [vmem:[#allocation2 + $0x4c0] sm:$0xf]  ;;  %v3678_v49 = vld [vmem:[#allocation2 + $0x4cc] sm:$0xf0]  ;;  %v3934_v55 = vpack.c.bf16 %v50_v40, %v50_v40  ;;  %v3155_v56 = vor.u32 %v3718_v39, %v3154_v38  ;;  %1319 = vmatpush.bf16.msrb.mxu1 %v3139_v46  ;;  %v3568_v35 = vld [vmem:[#allocation2 + $0x164] sm:$0xf]  ;;  %v2439_v38 = vor.u32 %v3536_v30, %v2436_v31 }
  0x2b   :  { %v3122_v50 = vld [vmem:[#allocation2 + $0x5c0] sm:$0xf]  ;;  %v3710_v52 = vld [vmem:[#allocation2 + $0x5cc] sm:$0xf0]  ;;  %v2995_v60 = vor.u32 %v3678_v49, %v2994_v48  ;;  %1288 = vmatmul.bf16.vlgmr.msra.gmra.mxu2 %v3932_v51  ;;  %1301 = vmatmul.bf16.vlgmr.msra.gmra.mxu3 %v3936_v57  ;;  %v2420_v44 = vld [vmem:[#allocation2 + $0x50] sm:$0xf0]  ;;  %v2567_v46 = vor.u32 %v3568_v35, %v2564_v36 }
  0x2c   :  { %1345 = vmatpush.bf16.msrb.mxu3 %v2503_v47  ;;  %v3123_v63 = vor.u32 %v3710_v52, %v3122_v50  ;;  %v2978_v1 = vld [vmem:[#allocation2 + $0x4a0] sm:$0xf]  ;;  %v3674_v2 = vld [vmem:[#allocation2 + $0x4ac] sm:$0xf0]  ;;  %1262 = vmatmul.bf16.vlgmr.msra.gmra.mxu0 %v3934_v55  ;;  %v3564_v48 = vld [vmem:[#allocation2 + $0x144] sm:$0xf]  ;;  %v2423_v52 = vor.u32 %v3532_v43, %v2420_v44 }
  0x2d   :  { %v3106_v3 = vld [vmem:[#allocation2 + $0x5a0] sm:$0xf]  ;;  %v3706_v4 = vld [vmem:[#allocation2 + $0x5ac] sm:$0xf0]  ;;  %1339 = vmatpush.bf16.msrb.mxu2 %v3155_v56  ;;  %1307 = vmatpush.bf16.msrb.mxu0 %v2995_v60  ;;  %v2979_v9 = vor.u32 %v3674_v2, %v2978_v1  ;;  %v2548_v49 = vld [vmem:[#allocation2 + $0x150] sm:$0xf0] }
  0x2e   :  { %1320 = vmatpush.bf16.msrb.mxu1 %v3123_v63  ;;  %v3107_v12 = vor.u32 %v3706_v4, %v3106_v3  ;;  %v2962_v14 = vld [vmem:[#allocation2 + $0x480] sm:$0xf]  ;;  %v3670_v15 = vld [vmem:[#allocation2 + $0x48c] sm:$0xf0]  ;;  %v2404_v60 = vld [vmem:[#allocation2 + $0x30] sm:$0xf0]  ;;  %v2551_v61 = vor.u32 %v3564_v48, %v2548_v49 }
  0x2f   :  { %v3090_v16 = vld [vmem:[#allocation2 + $0x580] sm:$0xf]  ;;  %v3702_v17 = vld [vmem:[#allocation2 + $0x58c] sm:$0xf0]  ;;  %v2963_v21 = vor.u32 %v3670_v15, %v2962_v14  ;;  %v3560_v63 = vld [vmem:[#allocation2 + $0x124] sm:$0xf] }
  0x30   :  { %1346 = vmatpush.bf16.msrb.mxu3 %v2487_v0  ;;  %v3091_v24 = vor.u32 %v3702_v17, %v3090_v16  ;;  %v2946_v26 = vld [vmem:[#allocation2 + $0x460] sm:$0xf]  ;;  %v3666_v27 = vld [vmem:[#allocation2 + $0x46c] sm:$0xf0]  ;;  %v2532_v0 = vld [vmem:[#allocation2 + $0x130] sm:$0xf0] }
  0x31   :  { %1358 = vmatpush.bf16.msra.mxu2 %v2631_v59  ;;  %1308 = vmatpush.bf16.msrb.mxu0 %v2979_v9  ;;  %v3074_v28 = vld [vmem:[#allocation2 + $0x560] sm:$0xf]  ;;  %v3698_v29 = vld [vmem:[#allocation2 + $0x56c] sm:$0xf0]  ;;  %v2947_v34 = vor.u32 %v3666_v27, %v2946_v26  ;;  %v3528_v59 = vld [vmem:[#allocation2 + $0x24] sm:$0xf]  ;;  %v2535_v14 = vor.u32 %v3560_v63, %v2532_v0 }
  0x32   :  { %1321 = vmatpush.bf16.msrb.mxu1 %v3107_v12  ;;  %v56_v32 = vld [vmem:[%s4486_s0 + $0x30] sm:$0xff]  ;;  %v3075_v37 = vor.u32 %v3698_v29, %v3074_v28  ;;  %v2930_v39 = vld [vmem:[#allocation2 + $0x440] sm:$0xf]  ;;  %v2407_v3 = vor.u32 %v3528_v59, %v2404_v60  ;;  %v3616_v10 = vld [vmem:[#allocation2 + $0x2e4] sm:$0xf] }
  0x33   :  { %v3662_v40 = vld [vmem:[#allocation2 + $0x44c] sm:$0xf0]  ;;  %v3058_v41 = vld [vmem:[#allocation2 + $0x540] sm:$0xf]  ;;  %v3950_v45 = vpack.c.bf16 %v56_v32, %v56_v32  ;;  %v2388_v9 = vld [vmem:[#allocation2 + $0x10] sm:$0xf0] }
  0x34   :  { %1347 = vmatpush.bf16.msrb.mxu3 %v2471_v13  ;;  %v3694_v42 = vld [vmem:[#allocation2 + $0x54c] sm:$0xf0]  ;;  %v2931_v47 = vor.u32 %v3662_v40, %v2930_v39  ;;  %v2914_v53 = vld [vmem:[#allocation2 + $0x420] sm:$0xf]  ;;  %v2756_v11 = vld [vmem:[#allocation2 + $0x2f0] sm:$0xf0] }
  0x35   :  { %1359 = vmatpush.bf16.msra.mxu2 %v2615_v8  ;;  %1309 = vmatpush.bf16.msrb.mxu0 %v2963_v21  ;;  %v3059_v50 = vor.u32 %v3694_v42, %v3058_v41  ;;  %v3658_v54 = vld [vmem:[#allocation2 + $0x42c] sm:$0xf0]  ;;  %v3042_v56 = vld [vmem:[#allocation2 + $0x520] sm:$0xf]  ;;  %v3524_v8 = vld [vmem:[#allocation2 + $0x4] sm:$0xf] }
  0x36   :  { %1322 = vmatpush.bf16.msrb.mxu1 %v3091_v24  ;;  %v3690_v58 = vld [vmem:[#allocation2 + $0x52c] sm:$0xf0]  ;;  %v2915_v62 = vor.u32 %v3658_v54, %v2914_v53  ;;  %v2898_v1 = vld [vmem:[#allocation2 + $0x400] sm:$0xf]  ;;  %v3648_v12 = vld [vmem:[#allocation2 + $0x3e4] sm:$0xf]  ;;  %v2759_v24 = vor.u32 %v3616_v10, %v2756_v11 }
  0x37   :  { %v3043_v2 = vor.u32 %v3690_v58, %v3042_v56  ;;  %v3654_v4 = vld [vmem:[#allocation2 + $0x40c] sm:$0xf0]  ;;  %v3026_v5 = vld [vmem:[#allocation2 + $0x500] sm:$0xf]  ;;  %v2884_v13 = vld [vmem:[#allocation2 + $0x3f0] sm:$0xf0] }
  0x38   :  { %1348 = vmatpush.bf16.msrb.mxu3 %v2455_v25  ;;  %v3686_v6 = vld [vmem:[#allocation2 + $0x50c] sm:$0xf0]  ;;  %v2899_v15 = vor.u32 %v3654_v4, %v2898_v1  ;;  %v3680_v16 = vld [vmem:[#allocation2 + $0x4e4] sm:$0xf]  ;;  %v3012_v17 = vld [vmem:[#allocation2 + $0x4f0] sm:$0xf0]  ;;  %v2887_v25 = vor.u32 %v3648_v12, %v2884_v13 }
  0x39   :  { %1360 = vmatpush.bf16.msra.mxu2 %v2599_v20  ;;  %1310 = vmatpush.bf16.msrb.mxu0 %v2947_v34  ;;  %v54_v18 = vld [vmem:[%s4486_s0 + $0x20] sm:$0xff]  ;;  %v3027_v19 = vor.u32 %v3686_v6, %v3026_v5  ;;  %v2391_v20 = vor.u32 %v3524_v8, %v2388_v9  ;;  %v2516_v22 = vld [vmem:[#allocation2 + $0x110] sm:$0xf0]  ;;  %v55_v23 = vld [vmem:[%s4486_s0 + $0x28] sm:$0xff]  ;;  %v3015_v29 = vor.u32 %v3680_v16, %v3012_v17 }
  0x3a   :  { %1323 = vmatpush.bf16.msrb.mxu1 %v3075_v37  ;;  %v3556_v21 = vld [vmem:[#allocation2 + $0x104] sm:$0xf]  ;;  %v3140_v27 = vld [vmem:[#allocation2 + $0x5f0] sm:$0xf0]  ;;  %v3960_v30 = vpack.c.bf16 %v54_v18, %v54_v18  ;;  %v3962_v35 = vpack.c.bf16 %v55_v23, %v55_v23 }
  0x3b   :  { %3168 = vmatmul.msk.bf16.vlgmr.msrb.gmra.mxu2 %vm1250_vm0, %v3950_v45  ;;  %v3712_v26 = vld [vmem:[#allocation2 + $0x5e4] sm:$0xf]  ;;  %v2740_v31 = vld [vmem:[#allocation2 + $0x2d0] sm:$0xf0]  ;;  %v2519_v34 = vor.u32 %v3556_v21, %v2516_v22 }
  0x3c   :  { %1349 = vmatpush.bf16.msrb.mxu3 %v2439_v38  ;;  %v3612_v28 = vld [vmem:[#allocation2 + $0x2c4] sm:$0xf]  ;;  %v2996_v37 = vld [vmem:[#allocation2 + $0x4d0] sm:$0xf0]  ;;  %v3143_v38 = vor.u32 %v3712_v26, %v3140_v27 }
  0x3d   :  { %1361 = vmatpush.bf16.msra.mxu2 %v2583_v33  ;;  %1311 = vmatpush.bf16.msrb.mxu0 %v2931_v47  ;;  %v3644_v32 = vld [vmem:[#allocation2 + $0x3c4] sm:$0xf]  ;;  %v2868_v33 = vld [vmem:[#allocation2 + $0x3d0] sm:$0xf0]  ;;  %v2743_v39 = vor.u32 %v3612_v28, %v2740_v31 }
  0x3e   :  { %1324 = vmatpush.bf16.msrb.mxu1 %v3059_v50  ;;  %v3676_v36 = vld [vmem:[#allocation2 + $0x4c4] sm:$0xf]  ;;  %v2871_v40 = vor.u32 %v3644_v32, %v2868_v33  ;;  %v3124_v42 = vld [vmem:[#allocation2 + $0x5d0] sm:$0xf0] }
  0x3f   :  { %v3708_v41 = vld [vmem:[#allocation2 + $0x5c4] sm:$0xf]  ;;  %v2999_v44 = vor.u32 %v3676_v36, %v2996_v37  ;;  %v2852_v48 = vld [vmem:[#allocation2 + $0x3b0] sm:$0xf0] }
  0x40   :  { %1350 = vmatpush.bf16.msrb.mxu3 %v2423_v52  ;;  %v3608_v43 = vld [vmem:[#allocation2 + $0x2a4] sm:$0xf]  ;;  %v2980_v50 = vld [vmem:[#allocation2 + $0x4b0] sm:$0xf0]  ;;  %v3127_v52 = vor.u32 %v3708_v41, %v3124_v42 }
  0x41   :  { %1362 = vmatpush.bf16.msra.mxu2 %v2567_v46  ;;  %1312 = vmatpush.bf16.msrb.mxu0 %v2915_v62  ;;  %v2724_v46 = vld [vmem:[#allocation2 + $0x2b0] sm:$0xf0]  ;;  %v3640_v47 = vld [vmem:[#allocation2 + $0x3a4] sm:$0xf] }
  0x42   :  { %1325 = vmatpush.bf16.msrb.mxu1 %v3043_v2  ;;  %v3672_v49 = vld [vmem:[#allocation2 + $0x4a4] sm:$0xf]  ;;  %v2727_v53 = vor.u32 %v3608_v43, %v2724_v46  ;;  %v2855_v54 = vor.u32 %v3640_v47, %v2852_v48  ;;  %v3108_v58 = vld [vmem:[#allocation2 + $0x5b0] sm:$0xf0] }
  0x43   :  { %v3704_v56 = vld [vmem:[#allocation2 + $0x5a4] sm:$0xf]  ;;  %v2983_v60 = vor.u32 %v3672_v49, %v2980_v50  ;;  %v2836_v63 = vld [vmem:[#allocation2 + $0x390] sm:$0xf0] }
  0x44   :  { %1351 = vmatpush.bf16.msrb.mxu3 %v2407_v3  ;;  %v3604_v59 = vld [vmem:[#allocation2 + $0x284] sm:$0xf]  ;;  %v2964_v1 = vld [vmem:[#allocation2 + $0x490] sm:$0xf0]  ;;  %v3111_v2 = vor.u32 %v3704_v56, %v3108_v58  ;;  %v2506_v56 = vld [vmem:[#allocation2 + $0xe8] sm:$0xf] }
  0x45   :  { %1363 = vmatpush.bf16.msra.mxu2 %v2551_v61  ;;  %1313 = vmatpush.bf16.msrb.mxu0 %v2899_v15  ;;  %v2708_v61 = vld [vmem:[#allocation2 + $0x290] sm:$0xf0]  ;;  %v3636_v62 = vld [vmem:[#allocation2 + $0x384] sm:$0xf]  ;;  %v3555_v58 = vld [vmem:[#allocation2 + $0xf4] sm:$0xf0] }
  0x46   :  { %1326 = vmatpush.bf16.msrb.mxu1 %v3027_v19  ;;  %v3668_v0 = vld [vmem:[#allocation2 + $0x484] sm:$0xf]  ;;  %v2711_v3 = vor.u32 %v3604_v59, %v2708_v61  ;;  %v2839_v4 = vor.u32 %v3636_v62, %v2836_v63  ;;  %v3092_v6 = vld [vmem:[#allocation2 + $0x590] sm:$0xf0]  ;;  %v2634_v59 = vld [vmem:[#allocation2 + $0x1e8] sm:$0xf] }
  0x47   :  { %v3700_v5 = vld [vmem:[#allocation2 + $0x584] sm:$0xf]  ;;  %v2967_v9 = vor.u32 %v3668_v0, %v2964_v1  ;;  %v2692_v10 = vld [vmem:[#allocation2 + $0x270] sm:$0xf0]  ;;  %v3587_v61 = vld [vmem:[#allocation2 + $0x1f4] sm:$0xf0] }
  0x48   :  { %1352 = vmatpush.bf16.msrb.mxu3 %v2391_v20  ;;  %1314 = vmatmul.bf16.vlgmr.msrb.gmra.mxu0 %v3960_v30  ;;  %v3600_v8 = vld [vmem:[#allocation2 + $0x264] sm:$0xf]  ;;  %v2820_v12 = vld [vmem:[#allocation2 + $0x370] sm:$0xf0]  ;;  %v3095_v15 = vor.u32 %v3700_v5, %v3092_v6  ;;  %v2507_v6 = vor.u32 %v3555_v58, %v2506_v56  ;;  %v3539_v56 = vld [vmem:[#allocation2 + $0x74] sm:$0xf0] }
  0x49   :  { %1364 = vmatpush.bf16.msra.mxu2 %v2535_v14  ;;  %1371 = vmatpush.bf16.msra.mxu0 %v2759_v24  ;;  %v3632_v11 = vld [vmem:[#allocation2 + $0x364] sm:$0xf]  ;;  %v2948_v14 = vld [vmem:[#allocation2 + $0x470] sm:$0xf0]  ;;  %v2695_v16 = vor.u32 %v3600_v8, %v2692_v10  ;;  %v3619_v8 = vld [vmem:[#allocation2 + $0x2f4] sm:$0xf0] }
  0x4a   :  { %1384 = vmatpush.bf16.msra.mxu1 %v2887_v25  ;;  %v3664_v13 = vld [vmem:[#allocation2 + $0x464] sm:$0xf]  ;;  %v2823_v17 = vor.u32 %v3632_v11, %v2820_v12  ;;  %v3076_v19 = vld [vmem:[#allocation2 + $0x570] sm:$0xf0]  ;;  %v3651_v10 = vld [vmem:[#allocation2 + $0x3f4] sm:$0xf0]  ;;  %v2635_v11 = vor.u32 %v3587_v61, %v2634_v59 }
  0x4b   :  { %1327 = vmatmul.bf16.vlgmr.msrb.gmra.mxu1 %v3962_v35  ;;  %1353 = vmatmul.bf16.vlgmr.msrb.gmra.mxu3 %v3934_v55  ;;  %v3696_v18 = vld [vmem:[#allocation2 + $0x564] sm:$0xf]  ;;  %v2951_v21 = vor.u32 %v3664_v13, %v2948_v14  ;;  %v2676_v22 = vld [vmem:[#allocation2 + $0x250] sm:$0xf0]  ;;  %v2490_v13 = vld [vmem:[#allocation2 + $0xc8] sm:$0xf] }
  0x4c   :  { %1397 = vmatpush.bf16.msra.mxu3 %v3015_v29  ;;  %v3596_v20 = vld [vmem:[#allocation2 + $0x244] sm:$0xf]  ;;  %v2804_v24 = vld [vmem:[#allocation2 + $0x350] sm:$0xf0]  ;;  %v3079_v27 = vor.u32 %v3696_v18, %v3076_v19  ;;  %v3551_v14 = vld [vmem:[#allocation2 + $0xd4] sm:$0xf0] }
  0x4d   :  { %1365 = vmatpush.bf16.msra.mxu2 %v2519_v34  ;;  %1372 = vmatpush.bf16.msra.mxu0 %v2743_v39  ;;  %v3628_v23 = vld [vmem:[#allocation2 + $0x344] sm:$0xf]  ;;  %v2932_v26 = vld [vmem:[#allocation2 + $0x450] sm:$0xf0]  ;;  %v2679_v28 = vor.u32 %v3596_v20, %v2676_v22  ;;  %v2746_v20 = vld [vmem:[#allocation2 + $0x2c8] sm:$0xf] }
  0x4e   :  { %1385 = vmatpush.bf16.msra.mxu1 %v2871_v40  ;;  %v3660_v25 = vld [vmem:[#allocation2 + $0x444] sm:$0xf]  ;;  %v2807_v29 = vor.u32 %v3628_v23, %v2804_v24  ;;  %v3060_v32 = vld [vmem:[#allocation2 + $0x550] sm:$0xf0]  ;;  %v3615_v22 = vld [vmem:[#allocation2 + $0x2d4] sm:$0xf0] }
  0x4f   :  { %v3692_v31 = vld [vmem:[#allocation2 + $0x544] sm:$0xf]  ;;  %v2935_v34 = vor.u32 %v3660_v25, %v2932_v26  ;;  %v2660_v36 = vld [vmem:[#allocation2 + $0x230] sm:$0xf0]  ;;  %v2874_v23 = vld [vmem:[#allocation2 + $0x3c8] sm:$0xf] }
  0x50   :  { %1398 = vmatpush.bf16.msra.mxu3 %v2999_v44  ;;  %1366 = vmatmul.bf16.vlgmr.msra.gmra.mxu2 %v3943_v7  ;;  %v3592_v33 = vld [vmem:[#allocation2 + $0x224] sm:$0xf]  ;;  %v2916_v40 = vld [vmem:[#allocation2 + $0x430] sm:$0xf0]  ;;  %v3063_v41 = vor.u32 %v3692_v31, %v3060_v32  ;;  %v3647_v24 = vld [vmem:[#allocation2 + $0x3d4] sm:$0xf0]  ;;  %v2747_v31 = vor.u32 %v3615_v22, %v2746_v20 }
  0x51   :  { %1410 = vmatpush.bf16.msrb.mxu2 %v3143_v38  ;;  %1373 = vmatpush.bf16.msra.mxu0 %v2727_v53  ;;  %v3624_v37 = vld [vmem:[#allocation2 + $0x324] sm:$0xf]  ;;  %v2788_v38 = vld [vmem:[#allocation2 + $0x330] sm:$0xf0]  ;;  %v2663_v44 = vor.u32 %v3592_v33, %v2660_v36  ;;  %v2474_v26 = vld [vmem:[#allocation2 + $0xa8] sm:$0xf]  ;;  %v2875_v32 = vor.u32 %v3647_v24, %v2874_v23 }
  0x52   :  { %1386 = vmatpush.bf16.msra.mxu1 %v2855_v54  ;;  %v3656_v39 = vld [vmem:[#allocation2 + $0x424] sm:$0xf]  ;;  %v3044_v43 = vld [vmem:[#allocation2 + $0x530] sm:$0xf0]  ;;  %v2791_v46 = vor.u32 %v3624_v37, %v2788_v38  ;;  %v2730_v33 = vld [vmem:[#allocation2 + $0x2a8] sm:$0xf] }
  0x53   :  { %v3688_v42 = vld [vmem:[#allocation2 + $0x524] sm:$0xf]  ;;  %v2644_v48 = vld [vmem:[#allocation2 + $0x210] sm:$0xf0]  ;;  %v2919_v50 = vor.u32 %v3656_v39, %v2916_v40  ;;  %v3611_v36 = vld [vmem:[#allocation2 + $0x2b4] sm:$0xf0] }
  0x54   :  { %1399 = vmatpush.bf16.msra.mxu3 %v2983_v60  ;;  %v3588_v47 = vld [vmem:[#allocation2 + $0x204] sm:$0xf]  ;;  %v2900_v54 = vld [vmem:[#allocation2 + $0x410] sm:$0xf0]  ;;  %v3047_v60 = vor.u32 %v3688_v42, %v3044_v43  ;;  %v2858_v37 = vld [vmem:[#allocation2 + $0x3a8] sm:$0xf] }
  0x55   :  { %1411 = vmatpush.bf16.msrb.mxu2 %v3127_v52  ;;  %1374 = vmatpush.bf16.msra.mxu0 %v2711_v3  ;;  %v3620_v49 = vld [vmem:[#allocation2 + $0x304] sm:$0xf]  ;;  %v2772_v52 = vld [vmem:[#allocation2 + $0x310] sm:$0xf0]  ;;  %v2647_v0 = vor.u32 %v3588_v47, %v2644_v48  ;;  %v3643_v38 = vld [vmem:[#allocation2 + $0x3b4] sm:$0xf0] }
  0x56   :  { %1387 = vmatpush.bf16.msra.mxu1 %v2839_v4  ;;  %v3652_v53 = vld [vmem:[#allocation2 + $0x404] sm:$0xf]  ;;  %v3156_v63 = vld [vmem:[#allocation2 + $0x610] sm:$0xf0]  ;;  %v2775_v1 = vor.u32 %v3620_v49, %v2772_v52  ;;  %v2762_v4 = vld [vmem:[#allocation2 + $0x2e8] sm:$0xf] }
  0x57   :  { %v3716_v62 = vld [vmem:[#allocation2 + $0x604] sm:$0xf]  ;;  %v3028_v3 = vld [vmem:[#allocation2 + $0x510] sm:$0xf0]  ;;  %v2903_v5 = vor.u32 %v3652_v53, %v2900_v54  ;;  %v2763_v18 = vor.u32 %v3619_v8, %v2762_v4  ;;  %v2458_v40 = vld [vmem:[#allocation2 + $0x88] sm:$0xf] }
  0x58   :  { %1400 = vmatpush.bf16.msra.mxu3 %v2967_v9  ;;  %v2890_v9 = vld [vmem:[#allocation2 + $0x3e8] sm:$0xf]  ;;  %v3159_v12 = vor.u32 %v3716_v62, %v3156_v63  ;;  %v3575_v43 = vld [vmem:[#allocation2 + $0x194] sm:$0xf0] }
  0x59   :  { %1412 = vmatpush.bf16.msrb.mxu2 %v3111_v2  ;;  %1375 = vmatpush.bf16.msra.mxu0 %v2695_v16  ;;  %v3684_v2 = vld [vmem:[#allocation2 + $0x504] sm:$0xf]  ;;  %v2618_v16 = vld [vmem:[#allocation2 + $0x1c8] sm:$0xf]  ;;  %v2891_v19 = vor.u32 %v3651_v10, %v2890_v9  ;;  %v3607_v49 = vld [vmem:[#allocation2 + $0x294] sm:$0xf0] }
  0x5a   :  { %1388 = vmatpush.bf16.msra.mxu1 %v2823_v17  ;;  %v3583_v17 = vld [vmem:[#allocation2 + $0x1d4] sm:$0xf0]  ;;  %v2586_v42 = vld [vmem:[#allocation2 + $0x188] sm:$0xf] }
  0x5b   :  { %v2619_v25 = vor.u32 %v3583_v17, %v2618_v16  ;;  %v2714_v47 = vld [vmem:[#allocation2 + $0x288] sm:$0xf]  ;;  %v3639_v52 = vld [vmem:[#allocation2 + $0x394] sm:$0xf0]  ;;  %v2587_v53 = vor.u32 %v3575_v43, %v2586_v42 }
  0x5c   :  { %1401 = vmatpush.bf16.msra.mxu3 %v2951_v21  ;;  %v2491_v21 = vor.u32 %v3551_v14, %v2490_v13  ;;  %v2442_v54 = vld [vmem:[#allocation2 + $0x68] sm:$0xf]  ;;  %v3571_v59 = vld [vmem:[#allocation2 + $0x174] sm:$0xf0] }
  0x5d   :  { %1413 = vmatpush.bf16.msrb.mxu2 %v3095_v15  ;;  %1376 = vmatpush.bf16.msra.mxu0 %v2679_v28  ;;  %v3031_v15 = vor.u32 %v3684_v2, %v3028_v3  ;;  %v2602_v28 = vld [vmem:[#allocation2 + $0x1a8] sm:$0xf]  ;;  %v2443_v63 = vor.u32 %v3539_v56, %v2442_v54  ;;  %v3635_v2 = vld [vmem:[#allocation2 + $0x374] sm:$0xf0] }
  0x5e   :  { %1389 = vmatpush.bf16.msra.mxu1 %v2807_v29  ;;  %v3579_v29 = vld [vmem:[#allocation2 + $0x1b4] sm:$0xf0]  ;;  %v2570_v58 = vld [vmem:[#allocation2 + $0x168] sm:$0xf] }
  0x5f   :  { %v2603_v39 = vor.u32 %v3579_v29, %v2602_v28  ;;  %v2698_v62 = vld [vmem:[#allocation2 + $0x268] sm:$0xf]  ;;  %v2571_v3 = vor.u32 %v3571_v59, %v2570_v58  ;;  %v3567_v8 = vld [vmem:[#allocation2 + $0x154] sm:$0xf0] }
  0x60   :  { %1402 = vmatpush.bf16.msra.mxu3 %v2935_v34  ;;  %v2426_v4 = vld [vmem:[#allocation2 + $0x48] sm:$0xf]  ;;  %v3599_v13 = vld [vmem:[#allocation2 + $0x254] sm:$0xf0] }
  0x61   :  { %1414 = vmatpush.bf16.msrb.mxu2 %v3079_v27  ;;  %1377 = vmatpush.bf16.msra.mxu0 %v2663_v44  ;;  %v3547_v27 = vld [vmem:[#allocation2 + $0xb4] sm:$0xf0]  ;;  %v2731_v44 = vor.u32 %v3611_v36, %v2730_v33  ;;  %v2810_v14 = vld [vmem:[#allocation2 + $0x348] sm:$0xf] }
  0x62   :  { %1390 = vmatpush.bf16.msra.mxu1 %v2791_v46  ;;  %v2475_v34 = vor.u32 %v3547_v27, %v2474_v26  ;;  %v2859_v46 = vor.u32 %v3643_v38, %v2858_v37  ;;  %v2410_v17 = vld [vmem:[#allocation2 + $0x28] sm:$0xf]  ;;  %v3563_v20 = vld [vmem:[#allocation2 + $0x134] sm:$0xf0] }
  0x63   :  { %v2666_v23 = vld [vmem:[#allocation2 + $0x228] sm:$0xf]  ;;  %v3595_v24 = vld [vmem:[#allocation2 + $0x234] sm:$0xf0] }
  0x64   :  { %1403 = vmatpush.bf16.msra.mxu3 %v2919_v50  ;;  %v2842_v50 = vld [vmem:[#allocation2 + $0x388] sm:$0xf]  ;;  %v3627_v27 = vld [vmem:[#allocation2 + $0x334] sm:$0xf0]  ;;  %v2667_v38 = vor.u32 %v3595_v24, %v2666_v23 }
  0x65   :  { %1415 = vmatpush.bf16.msrb.mxu2 %v3063_v41  ;;  %1378 = vmatpush.bf16.msra.mxu0 %v2647_v0  ;;  %v3543_v41 = vld [vmem:[#allocation2 + $0x94] sm:$0xf0]  ;;  %v2843_v61 = vor.u32 %v3639_v52, %v2842_v50  ;;  %v2794_v26 = vld [vmem:[#allocation2 + $0x328] sm:$0xf]  ;;  %v2508_v50 = vld [vmem:[#allocation2 + $0xf8] sm:$0xf0] }
  0x66   :  { %1391 = vmatpush.bf16.msra.mxu1 %v2775_v1  ;;  %v2459_v48 = vor.u32 %v3543_v41, %v2458_v40  ;;  %v3603_v0 = vld [vmem:[#allocation2 + $0x274] sm:$0xf0]  ;;  %v2826_v1 = vld [vmem:[#allocation2 + $0x368] sm:$0xf] }
  0x67   :  { %v2699_v9 = vor.u32 %v3603_v0, %v2698_v62  ;;  %v2827_v10 = vor.u32 %v3635_v2, %v2826_v1  ;;  %v2394_v28 = vld [vmem:[#allocation2 + $0x8] sm:$0xf]  ;;  %v3559_v33 = vld [vmem:[#allocation2 + $0x114] sm:$0xf0]  ;;  %v3585_v1 = vld [vmem:[#allocation2 + $0x1ec] sm:$0xf] }
  0x68   :  { %1404 = vmatpush.bf16.msra.mxu3 %v2903_v5  ;;  %1379 = vmatmul.bf16.vlgmr.msra.gmra.mxu0 %v3932_v51  ;;  %v3535_v5 = vld [vmem:[#allocation2 + $0x54] sm:$0xf0]  ;;  %v3146_v37 = vld [vmem:[#allocation2 + $0x5e8] sm:$0xf]  ;;  %v2636_v2 = vld [vmem:[#allocation2 + $0x1f8] sm:$0xf0] }
  0x69   :  { %1416 = vmatpush.bf16.msrb.mxu2 %v3047_v60  ;;  %1430 = vmatpush.bf16.msrb.mxu0 %v3159_v12  ;;  %v2715_v60 = vor.u32 %v3607_v49, %v2714_v47  ;;  %v2427_v12 = vor.u32 %v3535_v5, %v2426_v4  ;;  %v3683_v36 = vld [vmem:[#allocation2 + $0x4f4] sm:$0xf0]  ;;  %v2650_v41 = vld [vmem:[#allocation2 + $0x208] sm:$0xf]  ;;  %v3553_v47 = vld [vmem:[#allocation2 + $0xec] sm:$0xf] }
  0x6a   :  { %1436 = vmatpush.bf16.msrb.mxu1 %v2507_v6  ;;  %v2554_v6 = vld [vmem:[#allocation2 + $0x148] sm:$0xf]  ;;  %v3715_v40 = vld [vmem:[#allocation2 + $0x5f4] sm:$0xf0]  ;;  %v3549_v4 = vld [vmem:[#allocation2 + $0xcc] sm:$0xf] }
  0x6b   :  { %1405 = vmatmul.bf16.vlgmr.msra.gmra.mxu3 %v3960_v30  ;;  %1392 = vmatmul.bf16.vlgmr.msra.gmra.mxu1 %v3936_v57  ;;  %v2555_v16 = vor.u32 %v3567_v8, %v2554_v6  ;;  %v3591_v42 = vld [vmem:[#allocation2 + $0x214] sm:$0xf0]  ;;  %v3162_v52 = vld [vmem:[#allocation2 + $0x608] sm:$0xf]  ;;  %v3147_v54 = vor.u32 %v3715_v40, %v3146_v37  ;;  %v2492_v5 = vld [vmem:[#allocation2 + $0xd8] sm:$0xf0] }
  0x6c   :  { %1449 = vmatpush.bf16.msrb.mxu3 %v2635_v11  ;;  %v2682_v11 = vld [vmem:[#allocation2 + $0x248] sm:$0xf]  ;;  %v3679_v58 = vld [vmem:[#allocation2 + $0x4d4] sm:$0xf0]  ;;  %v2651_v59 = vor.u32 %v3591_v42, %v2650_v41  ;;  %v3573_v40 = vld [vmem:[#allocation2 + $0x18c] sm:$0xf] }
  0x6d   :  { %1417 = vmatpush.bf16.msrb.mxu2 %v3031_v15  ;;  %1462 = vmatpush.bf16.msra.mxu0 %v2763_v18  ;;  %v3631_v15 = vld [vmem:[#allocation2 + $0x354] sm:$0xf0]  ;;  %v3002_v56 = vld [vmem:[#allocation2 + $0x4c8] sm:$0xf]  ;;  %v2588_v41 = vld [vmem:[#allocation2 + $0x198] sm:$0xf0] }
  0x6e   :  { %1437 = vmatpush.bf16.msrb.mxu1 %v2491_v21  ;;  %v3531_v18 = vld [vmem:[#allocation2 + $0x34] sm:$0xf0]  ;;  %v2683_v21 = vor.u32 %v3599_v13, %v2682_v11  ;;  %v2811_v22 = vor.u32 %v3631_v15, %v2810_v14  ;;  %v2986_v8 = vld [vmem:[#allocation2 + $0x4a8] sm:$0xf]  ;;  %v2495_v13 = vor.u32 %v3549_v4, %v2492_v5  ;;  %v3581_v14 = vld [vmem:[#allocation2 + $0x1cc] sm:$0xf] }
  0x6f   :  { %v3711_v62 = vld [vmem:[#allocation2 + $0x5d4] sm:$0xf0]  ;;  %v3114_v11 = vld [vmem:[#allocation2 + $0x5a8] sm:$0xf]  ;;  %v2620_v15 = vld [vmem:[#allocation2 + $0x1d8] sm:$0xf0] }
  0x70   :  { %1450 = vmatpush.bf16.msrb.mxu3 %v2619_v25  ;;  %1418 = vmatmul.bf16.vlgmr.msrb.gmra.mxu2 %v3962_v35  ;;  %v2411_v25 = vor.u32 %v3531_v18, %v2410_v17  ;;  %v3545_v17 = vld [vmem:[#allocation2 + $0xac] sm:$0xf]  ;;  %v2476_v18 = vld [vmem:[#allocation2 + $0xb8] sm:$0xf0]  ;;  %v3098_v23 = vld [vmem:[#allocation2 + $0x588] sm:$0xf] }
  0x71   :  { %1475 = vmatpush.bf16.msra.mxu2 %v2891_v19  ;;  %1463 = vmatpush.bf16.msra.mxu0 %v2747_v31  ;;  %v2538_v19 = vld [vmem:[#allocation2 + $0x128] sm:$0xf]  ;;  %v3527_v31 = vld [vmem:[#allocation2 + $0x14] sm:$0xf0]  ;;  %v3565_v4 = vld [vmem:[#allocation2 + $0x14c] sm:$0xf] }
  0x72   :  { %1438 = vmatpush.bf16.msrb.mxu1 %v2475_v34  ;;  %v2539_v29 = vor.u32 %v3563_v20, %v2538_v19  ;;  %v3018_v34 = vld [vmem:[#allocation2 + $0x4e8] sm:$0xf]  ;;  %v2395_v43 = vor.u32 %v3527_v31, %v2394_v28  ;;  %v3703_v24 = vld [vmem:[#allocation2 + $0x594] sm:$0xf0]  ;;  %v2460_v31 = vld [vmem:[#allocation2 + $0x98] sm:$0xf0] }
  0x73   :  { %v3019_v49 = vor.u32 %v3683_v36, %v3018_v34  ;;  %v2970_v20 = vld [vmem:[#allocation2 + $0x488] sm:$0xf]  ;;  %v3667_v34 = vld [vmem:[#allocation2 + $0x474] sm:$0xf0]  ;;  %v2556_v5 = vld [vmem:[#allocation2 + $0x158] sm:$0xf0] }
  0x74   :  { %1451 = vmatpush.bf16.msrb.mxu3 %v2603_v39  ;;  %v2795_v39 = vor.u32 %v3627_v27, %v2794_v26  ;;  %v3577_v26 = vld [vmem:[#allocation2 + $0x1ac] sm:$0xf]  ;;  %v2604_v27 = vld [vmem:[#allocation2 + $0x1b8] sm:$0xf0]  ;;  %v3082_v37 = vld [vmem:[#allocation2 + $0x568] sm:$0xf] }
  0x75   :  { %1476 = vmatpush.bf16.msra.mxu2 %v2875_v32  ;;  %1464 = vmatpush.bf16.msra.mxu0 %v2731_v44  ;;  %v2522_v32 = vld [vmem:[#allocation2 + $0x108] sm:$0xf]  ;;  %v2607_v36 = vor.u32 %v3577_v26, %v2604_v27 }
  0x76   :  { %1439 = vmatpush.bf16.msrb.mxu1 %v2459_v48  ;;  %v2778_v44 = vld [vmem:[#allocation2 + $0x308] sm:$0xf]  ;;  %v2523_v48 = vor.u32 %v3559_v33, %v2522_v32  ;;  %v3099_v32 = vor.u32 %v3703_v24, %v3098_v23  ;;  %v3525_v24 = vld [vmem:[#allocation2 + $0xc] sm:$0xf] }
  0x77   :  { %v2954_v33 = vld [vmem:[#allocation2 + $0x468] sm:$0xf] }
  0x78   :  { %1452 = vmatpush.bf16.msrb.mxu3 %v2587_v53  ;;  %3169 = vmatmul.msk.bf16.vlgmr.msrb.gmra.mxu0 %vm1250_vm0, %v3950_v45  ;;  %v3719_v53 = vld [vmem:[#allocation2 + $0x614] sm:$0xf0]  ;;  %v2955_v42 = vor.u32 %v3667_v34, %v2954_v33  ;;  %v3613_v33 = vld [vmem:[#allocation2 + $0x2cc] sm:$0xf]  ;;  %v2748_v34 = vld [vmem:[#allocation2 + $0x2d8] sm:$0xf0] }
  0x79   :  { %1477 = vmatpush.bf16.msra.mxu2 %v2859_v46  ;;  %1465 = vmatpush.bf16.msra.mxu0 %v2715_v60  ;;  %v3623_v46 = vld [vmem:[#allocation2 + $0x314] sm:$0xf0]  ;;  %v3163_v0 = vor.u32 %v3719_v53, %v3162_v52 }
  0x7a   :  { %1440 = vmatpush.bf16.msrb.mxu1 %v2443_v63  ;;  %v2779_v60 = vor.u32 %v3623_v46, %v2778_v44  ;;  %v2511_v63 = vor.u32 %v3553_v47, %v2508_v50  ;;  %v2444_v44 = vld [vmem:[#allocation2 + $0x78] sm:$0xf0]  ;;  %v2938_v47 = vld [vmem:[#allocation2 + $0x448] sm:$0xf]  ;;  %v3695_v52 = vld [vmem:[#allocation2 + $0x554] sm:$0xf0] }
  0x7b   :  { %v3066_v50 = vld [vmem:[#allocation2 + $0x548] sm:$0xf] }
  0x7c   :  { %1453 = vmatpush.bf16.msrb.mxu3 %v2571_v3  ;;  %v3003_v3 = vor.u32 %v3679_v58, %v3002_v56  ;;  %v2572_v56 = vld [vmem:[#allocation2 + $0x178] sm:$0xf0] }
  0x7d   :  { %1478 = vmatpush.bf16.msra.mxu2 %v2843_v61  ;;  %1466 = vmatpush.bf16.msra.mxu0 %v2699_v9  ;;  %v3130_v61 = vld [vmem:[#allocation2 + $0x5c8] sm:$0xf]  ;;  %v3675_v9 = vld [vmem:[#allocation2 + $0x4b4] sm:$0xf0] }
  0x7e   :  { %1441 = vmatpush.bf16.msrb.mxu1 %v2427_v12  ;;  %v3131_v6 = vor.u32 %v3711_v62, %v3130_v61  ;;  %v3707_v12 = vld [vmem:[#allocation2 + $0x5b4] sm:$0xf0]  ;;  %v3067_v61 = vor.u32 %v3695_v52, %v3066_v50  ;;  %v2922_v62 = vld [vmem:[#allocation2 + $0x428] sm:$0xf]  ;;  %v3609_v50 = vld [vmem:[#allocation2 + $0x2ac] sm:$0xf] }
  0x7f   :  { %v3115_v19 = vor.u32 %v3707_v12, %v3114_v11  ;;  %v3655_v12 = vld [vmem:[#allocation2 + $0x414] sm:$0xf0]  ;;  %v2732_v52 = vld [vmem:[#allocation2 + $0x2b8] sm:$0xf0] }
  0x80   :  { %1454 = vmatpush.bf16.msrb.mxu3 %v2555_v16  ;;  %v2987_v16 = vor.u32 %v3675_v9, %v2986_v8  ;;  %v3529_v8 = vld [vmem:[#allocation2 + $0x2c] sm:$0xf]  ;;  %v2412_v9 = vld [vmem:[#allocation2 + $0x38] sm:$0xf0] }
  0x81   :  { %1479 = vmatpush.bf16.msra.mxu2 %v2827_v10  ;;  %1467 = vmatpush.bf16.msra.mxu0 %v2683_v21  ;;  %v2639_v10 = vor.u32 %v3585_v1, %v2636_v2  ;;  %v3671_v21 = vld [vmem:[#allocation2 + $0x494] sm:$0xf0]  ;;  %v3050_v1 = vld [vmem:[#allocation2 + $0x528] sm:$0xf] }
  0x82   :  { %1442 = vmatpush.bf16.msrb.mxu1 %v2411_v25  ;;  %v2479_v25 = vor.u32 %v3545_v17, %v2476_v18  ;;  %v2971_v28 = vor.u32 %v3671_v21, %v2970_v20  ;;  %v3691_v2 = vld [vmem:[#allocation2 + $0x534] sm:$0xf0]  ;;  %v2764_v17 = vld [vmem:[#allocation2 + $0x2f8] sm:$0xf0]  ;;  %v3649_v18 = vld [vmem:[#allocation2 + $0x3ec] sm:$0xf] }
  0x83   :  { %v3051_v11 = vor.u32 %v3691_v2, %v3050_v1  ;;  %v2892_v20 = vld [vmem:[#allocation2 + $0x3f8] sm:$0xf0]  ;;  %v3561_v21 = vld [vmem:[#allocation2 + $0x12c] sm:$0xf] }
  0x84   :  { %1455 = vmatpush.bf16.msrb.mxu3 %v2539_v29  ;;  %v3541_v29 = vld [vmem:[#allocation2 + $0x8c] sm:$0xf]  ;;  %v2716_v2 = vld [vmem:[#allocation2 + $0x298] sm:$0xf0] }
  0x85   :  { %1480 = vmatpush.bf16.msra.mxu2 %v2811_v22  ;;  %1468 = vmatpush.bf16.msra.mxu0 %v2667_v38  ;;  %v2623_v22 = vor.u32 %v3581_v14, %v2620_v15  ;;  %v3699_v38 = vld [vmem:[#allocation2 + $0x574] sm:$0xf0]  ;;  %v2559_v15 = vor.u32 %v3565_v4, %v2556_v5  ;;  %v3605_v1 = vld [vmem:[#allocation2 + $0x28c] sm:$0xf]  ;;  %v2844_v5 = vld [vmem:[#allocation2 + $0x398] sm:$0xf0] }
  0x86   :  { %1443 = vmatpush.bf16.msrb.mxu1 %v2395_v43  ;;  %v3537_v43 = vld [vmem:[#allocation2 + $0x6c] sm:$0xf]  ;;  %v3083_v46 = vor.u32 %v3699_v38, %v3082_v37  ;;  %v3687_v14 = vld [vmem:[#allocation2 + $0x514] sm:$0xf0]  ;;  %v2876_v38 = vld [vmem:[#allocation2 + $0x3d8] sm:$0xf0] }
  0x87   :  { %v2447_v53 = vor.u32 %v3537_v43, %v2444_v44  ;;  %v3148_v43 = vld [vmem:[#allocation2 + $0x5f8] sm:$0xf0]  ;;  %v2751_v44 = vor.u32 %v3613_v33, %v2748_v34  ;;  %v3637_v4 = vld [vmem:[#allocation2 + $0x38c] sm:$0xf] }
  0x88   :  { %1456 = vmatpush.bf16.msrb.mxu3 %v2523_v48  ;;  %v3663_v48 = vld [vmem:[#allocation2 + $0x454] sm:$0xf0]  ;;  %v3697_v33 = vld [vmem:[#allocation2 + $0x56c] sm:$0xf]  ;;  %v3084_v34 = vld [vmem:[#allocation2 + $0x578] sm:$0xf0] }
  0x89   :  { %1481 = vmatpush.bf16.msra.mxu2 %v2795_v39  ;;  %1469 = vmatpush.bf16.msra.mxu0 %v2651_v59  ;;  %v2463_v39 = vor.u32 %v3541_v29, %v2460_v31  ;;  %v2939_v58 = vor.u32 %v3663_v48, %v2938_v47  ;;  %v3533_v59 = vld [vmem:[#allocation2 + $0x4c] sm:$0xf]  ;;  %v3020_v29 = vld [vmem:[#allocation2 + $0x4f8] sm:$0xf0]  ;;  %v2895_v31 = vor.u32 %v3649_v18, %v2892_v20 }
  0x8a   :  { %1488 = vmatpush.bf16.msra.mxu1 %v3019_v49  ;;  %v2591_v49 = vor.u32 %v3573_v40, %v2588_v41  ;;  %v2524_v40 = vld [vmem:[#allocation2 + $0x118] sm:$0xf0]  ;;  %v3701_v20 = vld [vmem:[#allocation2 + $0x58c] sm:$0xf] }
  0x8b   :  { %1457 = vmatmul.bf16.vlgmr.msrb.gmra.mxu3 %v3943_v7  ;;  %1444 = vmatmul.bf16.vlgmr.msrb.gmra.mxu1 %v3934_v55  ;;  %v3004_v47 = vld [vmem:[#allocation2 + $0x4d8] sm:$0xf0] }
  0x8c   :  { %1501 = vmatpush.bf16.msra.mxu3 %v3147_v54  ;;  %1470 = vmatmul.bf16.vlgmr.msra.gmra.mxu0 %v3932_v51  ;;  %v3569_v54 = vld [vmem:[#allocation2 + $0x16c] sm:$0xf]  ;;  %v2828_v18 = vld [vmem:[#allocation2 + $0x378] sm:$0xf0] }
  0x8d   :  { %1482 = vmatpush.bf16.msra.mxu2 %v2779_v60  ;;  %1521 = vmatpush.bf16.msrb.mxu0 %v3163_v0  ;;  %v2428_v60 = vld [vmem:[#allocation2 + $0x58] sm:$0xf0]  ;;  %v2575_v0 = vor.u32 %v3569_v54, %v2572_v56  ;;  %v3641_v54 = vld [vmem:[#allocation2 + $0x3ac] sm:$0xf] }
  0x8e   :  { %1489 = vmatpush.bf16.msra.mxu1 %v3003_v3  ;;  %v2431_v3 = vor.u32 %v3533_v59, %v2428_v60  ;;  %v2860_v56 = vld [vmem:[#allocation2 + $0x3b8] sm:$0xf0]  ;;  %v3709_v59 = vld [vmem:[#allocation2 + $0x5cc] sm:$0xf] }
  0x8f   :  { %v3132_v60 = vld [vmem:[#allocation2 + $0x5d8] sm:$0xf0] }
  0x90   :  { %1502 = vmatpush.bf16.msra.mxu3 %v3131_v6  ;;  %1483 = vmatmul.bf16.vlgmr.msra.gmra.mxu2 %v3936_v57 }
  0x91   :  { %1527 = vmatpush.bf16.msrb.mxu2 %v2511_v63  ;;  %1540 = vmatpush.bf16.msra.mxu0 %v2639_v10  ;;  %v3659_v63 = vld [vmem:[#allocation2 + $0x434] sm:$0xf0]  ;;  %v2906_v10 = vld [vmem:[#allocation2 + $0x408] sm:$0xf] }
  0x92   :  { %1490 = vmatpush.bf16.msra.mxu1 %v2987_v16  ;;  %v2923_v6 = vor.u32 %v3659_v63, %v2922_v62  ;;  %v3617_v16 = vld [vmem:[#allocation2 + $0x2ec] sm:$0xf]  ;;  %v2907_v23 = vor.u32 %v3655_v12, %v2906_v10  ;;  %v2988_v63 = vld [vmem:[#allocation2 + $0x4b8] sm:$0xf0]  ;;  %v2719_v10 = vor.u32 %v3605_v1, %v2716_v2  ;;  %v3230_v1 = vld [vmem:[%s4489_s3 + $0x70] sm:$0xf] }
  0x93   :  { %v2767_v27 = vor.u32 %v3617_v16, %v2764_v17  ;;  %v3673_v62 = vld [vmem:[#allocation2 + $0x4ac] sm:$0xf]  ;;  %v2972_v12 = vld [vmem:[#allocation2 + $0x498] sm:$0xf0] }
  0x94   :  { %1503 = vmatpush.bf16.msra.mxu3 %v3115_v19  ;;  %v2415_v19 = vor.u32 %v3529_v8, %v2412_v9  ;;  %v3705_v8 = vld [vmem:[#allocation2 + $0x5ac] sm:$0xf]  ;;  %v3116_v9 = vld [vmem:[#allocation2 + $0x5b8] sm:$0xf0] }
  0x95   :  { %1528 = vmatpush.bf16.msrb.mxu2 %v2495_v13  ;;  %1541 = vmatpush.bf16.msra.mxu0 %v2623_v22  ;;  %v3034_v13 = vld [vmem:[#allocation2 + $0x508] sm:$0xf]  ;;  %v2540_v22 = vld [vmem:[#allocation2 + $0x138] sm:$0xf0]  ;;  %v3119_v16 = vor.u32 %v3705_v8, %v3116_v9  ;;  %v3633_v17 = vld [vmem:[#allocation2 + $0x36c] sm:$0xf] }
  0x96   :  { %1491 = vmatpush.bf16.msra.mxu1 %v2971_v28  ;;  %v3035_v26 = vor.u32 %v3687_v14, %v3034_v13  ;;  %v3681_v28 = vld [vmem:[#allocation2 + $0x4ec] sm:$0xf]  ;;  %v2847_v13 = vor.u32 %v3637_v4, %v2844_v5  ;;  %v3052_v9 = vld [vmem:[#allocation2 + $0x538] sm:$0xf0] }
  0x97   :  { %v3023_v41 = vor.u32 %v3681_v28, %v3020_v29  ;;  %v3601_v14 = vld [vmem:[#allocation2 + $0x26c] sm:$0xf] }
  0x98   :  { %1504 = vmatpush.bf16.msra.mxu3 %v3099_v32  ;;  %v2543_v32 = vor.u32 %v3561_v21, %v2540_v22  ;;  %v3100_v21 = vld [vmem:[#allocation2 + $0x598] sm:$0xf0]  ;;  %v3629_v29 = vld [vmem:[#allocation2 + $0x34c] sm:$0xf] }
  0x99   :  { %1529 = vmatpush.bf16.msrb.mxu2 %v2479_v25  ;;  %1542 = vmatpush.bf16.msra.mxu0 %v2607_v36  ;;  %v2396_v25 = vld [vmem:[#allocation2 + $0x18] sm:$0xf0]  ;;  %v3645_v36 = vld [vmem:[#allocation2 + $0x3cc] sm:$0xf] }
  0x9a   :  { %1492 = vmatpush.bf16.msra.mxu1 %v2955_v42  ;;  %v2399_v37 = vor.u32 %v3525_v24, %v2396_v25  ;;  %v3713_v42 = vld [vmem:[#allocation2 + $0x5ec] sm:$0xf]  ;;  %v2879_v48 = vor.u32 %v3645_v36, %v2876_v38  ;;  %v2956_v24 = vld [vmem:[#allocation2 + $0x478] sm:$0xf0] }
  0x9b   :  { %v3597_v25 = vld [vmem:[#allocation2 + $0x24c] sm:$0xf] }
  0x9c   :  { %1505 = vmatpush.bf16.msra.mxu3 %v3083_v46  ;;  %3170 = vmatmul.msk.bf16.vlgmr.msrb.gmra.mxu0 %vm1250_vm0, %v3950_v45  ;;  %v3677_v46 = vld [vmem:[#allocation2 + $0x4cc] sm:$0xf] }
  0x9d   :  { %1530 = vmatpush.bf16.msrb.mxu2 %v2463_v39  ;;  %1543 = vmatpush.bf16.msra.mxu0 %v2591_v49  ;;  %v3557_v39 = vld [vmem:[#allocation2 + $0x10c] sm:$0xf] }
  0x9e   :  { %1493 = vmatpush.bf16.msra.mxu1 %v2939_v58  ;;  %v2527_v49 = vor.u32 %v3557_v39, %v2524_v40  ;;  %v3007_v58 = vor.u32 %v3677_v46, %v3004_v47  ;;  %v3661_v38 = vld [vmem:[#allocation2 + $0x44c] sm:$0xf]  ;;  %v2940_v39 = vld [vmem:[#allocation2 + $0x458] sm:$0xf0] }
  0x9f   :  { %v3625_v46 = vld [vmem:[#allocation2 + $0x32c] sm:$0xf]  ;;  %v2796_v47 = vld [vmem:[#allocation2 + $0x338] sm:$0xf0] }
  0xa0   :  { %1506 = vmatpush.bf16.msra.mxu3 %v3067_v61  ;;  %v2735_v61 = vor.u32 %v3609_v50, %v2732_v52  ;;  %v3693_v50 = vld [vmem:[#allocation2 + $0x54c] sm:$0xf]  ;;  %v3068_v52 = vld [vmem:[#allocation2 + $0x558] sm:$0xf0] }
  0xa1   :  { %1531 = vmatpush.bf16.msrb.mxu2 %v2447_v53  ;;  %1544 = vmatpush.bf16.msra.mxu0 %v2575_v0  ;;  %v3151_v53 = vor.u32 %v3713_v42, %v3148_v43  ;;  %v2863_v0 = vor.u32 %v3641_v54, %v2860_v56  ;;  %v3593_v42 = vld [vmem:[#allocation2 + $0x22c] sm:$0xf]  ;;  %v2668_v43 = vld [vmem:[#allocation2 + $0x238] sm:$0xf0] }
  0xa2   :  { %1494 = vmatpush.bf16.msra.mxu1 %v2923_v6  ;;  %v2991_v6 = vor.u32 %v3673_v62, %v2988_v63  ;;  %v2671_v54 = vor.u32 %v3593_v42, %v2668_v43  ;;  %v3657_v56 = vld [vmem:[#allocation2 + $0x42c] sm:$0xf]  ;;  %v2780_v63 = vld [vmem:[#allocation2 + $0x318] sm:$0xf0] }
  0xa3   :  { %v3621_v62 = vld [vmem:[#allocation2 + $0x30c] sm:$0xf] }
  0xa4   :  { %1507 = vmatpush.bf16.msra.mxu3 %v3051_v11  ;;  %v3669_v11 = vld [vmem:[#allocation2 + $0x48c] sm:$0xf] }
  0xa5   :  { %1532 = vmatpush.bf16.msrb.mxu2 %v2431_v3  ;;  %1545 = vmatpush.bf16.msra.mxu0 %v2559_v15  ;;  %v3135_v3 = vor.u32 %v3709_v59, %v3132_v60  ;;  %v2700_v15 = vld [vmem:[#allocation2 + $0x278] sm:$0xf0]  ;;  %v3589_v59 = vld [vmem:[#allocation2 + $0x20c] sm:$0xf]  ;;  %v2799_v60 = vor.u32 %v3625_v46, %v2796_v47  ;;  %v3270_v46 = vld [vmem:[%s4489_s3 + $0xc0] sm:$0xf] }
  0xa6   :  { %1495 = vmatpush.bf16.msra.mxu1 %v2907_v23  ;;  %v2703_v22 = vor.u32 %v3601_v14, %v2700_v15  ;;  %v3665_v23 = vld [vmem:[#allocation2 + $0x46c] sm:$0xf]  ;;  %v3986_v28 = vpop.f32.mrf.mxu1  ;;  %v2783_v15 = vor.u32 %v3621_v62, %v2780_v63  ;;  %v3725_v62 = vld [vmem:[%s4489_s3 + $0x24] sm:$0xf0]  ;;  %v3254_v63 = vld [vmem:[%s4489_s3 + $0xa0] sm:$0xf] }
  0xa7   :  { %v3717_v2 = vld [vmem:[#allocation2 + $0x60c] sm:$0xf] }
  0xa8   :  { %1508 = vmatpush.bf16.msra.mxu3 %v3035_v26  ;;  %v2684_v26 = vld [vmem:[#allocation2 + $0x258] sm:$0xf0]  ;;  %v3689_v8 = vld [vmem:[#allocation2 + $0x52c] sm:$0xf] }
  0xa9   :  { %1533 = vmatpush.bf16.msrb.mxu2 %v2415_v19  ;;  %1546 = vmatpush.bf16.msra.mxu0 %v2543_v32  ;;  %v3984_v19 = vpop.f32.mrf.mxu0  ;;  %v2959_v32 = vor.u32 %v3665_v23, %v2956_v24  ;;  %v3222_v23 = vld [vmem:[%s4489_s3 + $0x60] sm:$0xf]  ;;  %v3733_v24 = vld [vmem:[%s4489_s3 + $0x64] sm:$0xf0] }
  0xaa   :  { %1553 = vmatpush.bf16.msrb.mxu1 %v2767_v27  ;;  %v3103_v27 = vor.u32 %v3701_v20, %v3100_v21  ;;  %v3055_v21 = vor.u32 %v3689_v8, %v3052_v9 }
  0xab   :  { %1496 = vmatmul.bf16.vlgmr.msra.gmra.mxu1 %v3960_v30  ;;  %1509 = vmatmul.bf16.vlgmr.msra.gmra.mxu3 %v3962_v35 }
  0xac   :  { %1566 = vmatpush.bf16.msrb.mxu3 %v2895_v31  ;;  %v2812_v31 = vld [vmem:[#allocation2 + $0x358] sm:$0xf0] }
  0xad   :  { %1534 = vmatpush.bf16.msrb.mxu2 %v2399_v37  ;;  %1547 = vmatpush.bf16.msra.mxu0 %v2527_v49  ;;  %v2687_v37 = vor.u32 %v3597_v25, %v2684_v26  ;;  %v2815_v40 = vor.u32 %v3629_v29, %v2812_v31  ;;  %v2943_v49 = vor.u32 %v3661_v38, %v2940_v39  ;;  %v3036_v25 = vld [vmem:[#allocation2 + $0x518] sm:$0xf0]  ;;  %v3286_v29 = vld [vmem:[%s4489_s3 + $0xe0] sm:$0xf]  ;;  %v3749_v31 = vld [vmem:[%s4489_s3 + $0xe4] sm:$0xf0] }
  0xae   :  { %1554 = vmatpush.bf16.msrb.mxu1 %v2751_v44  ;;  %v3988_v36 = vpop.f32.mrf.mxu2  ;;  %v3087_v44 = vor.u32 %v3697_v33, %v3084_v34  ;;  %v1278_v4 = vpop.f32.mrf.mxu1  ;;  %v3731_v34 = vld [vmem:[%s4489_s3 + $0x54] sm:$0xf0]  ;;  %v3287_v38 = vor.u32 %v3749_v31, %v3286_v29 }
  0xaf   :  { %v3723_v4 = vld [vmem:[%s4489_s3 + $0x14] sm:$0xf0] }
  0xb0   :  { %1567 = vmatpush.bf16.msrb.mxu3 %v2879_v48  ;;  %1535 = vmatmul.bf16.vlgmr.msrb.gmra.mxu2 %v3934_v55  ;;  %v2975_v55 = vor.u32 %v3669_v11, %v2972_v12  ;;  %v3653_v12 = vld [vmem:[#allocation2 + $0x40c] sm:$0xf] }
  0xb1   :  { %1579 = vmatpush.bf16.msra.mxu2 %v3023_v41  ;;  %1592 = vmatpush.bf16.msrb.mxu0 %v3151_v53  ;;  %v3990_v41 = vpop.f32.mrf.mxu3  ;;  %v1265_v48 = vpop.f32.mrf.mxu0  ;;  %v3995_v53 = vld [vmem:[%s4488_s2] sm:$0xf] }
  0xb2   :  { %1555 = vmatpush.bf16.msrb.mxu1 %v2735_v61  ;;  %1548 = vmatmul.bf16.vlgmr.msra.gmra.mxu0 %v3943_v7  ;;  %v2831_v7 = vor.u32 %v3633_v17, %v2828_v18  ;;  %v2652_v61 = vld [vmem:[#allocation2 + $0x218] sm:$0xf0]  ;;  %v262_v14 = vperm.slane %v3995_v53, 0  ;;  %v3294_v18 = vld [vmem:[%s4489_s3 + $0xf0] sm:$0xf] }
  0xb3   :  { %v2655_v11 = vor.u32 %v3589_v59, %v2652_v61  ;;  %v3190_v61 = vld [vmem:[%s4489_s3 + $0x20] sm:$0xf] }
  0xb4   :  { %1568 = vmatpush.bf16.msrb.mxu3 %v2863_v0  ;;  %v3071_v0 = vor.u32 %v3693_v50, %v3068_v52 }
  0xb5   :  { %1580 = vmatpush.bf16.msra.mxu2 %v3007_v58  ;;  %1593 = vmatpush.bf16.msrb.mxu0 %v3135_v3  ;;  %v2924_v58 = vld [vmem:[#allocation2 + $0x438] sm:$0xf0] }
  0xb6   :  { %1556 = vmatpush.bf16.msrb.mxu1 %v2719_v10  ;;  %v3164_v3 = vld [vmem:[#allocation2 + $0x618] sm:$0xf0]  ;;  %v2927_v5 = vor.u32 %v3657_v56, %v2924_v58  ;;  %v1291_v10 = vpop.f32.mrf.mxu2  ;;  %v3743_v58 = vld [vmem:[%s4489_s3 + $0xb4] sm:$0xf0] }
  0xb8   :  { %1569 = vmatpush.bf16.msrb.mxu3 %v2847_v13  ;;  %v2908_v13 = vld [vmem:[#allocation2 + $0x418] sm:$0xf0] }
  0xb9   :  { %1581 = vmatpush.bf16.msra.mxu2 %v2991_v6  ;;  %1594 = vmatpush.bf16.msrb.mxu0 %v3119_v16  ;;  %v3735_v6 = vld [vmem:[%s4489_s3 + $0x74] sm:$0xf0]  ;;  %v3167_v16 = vor.u32 %v3717_v2, %v3164_v3  ;;  %v1304_v17 = vpop.f32.mrf.mxu3  ;;  %v3182_v3 = vld [vmem:[%s4489_s3 + $0x10] sm:$0xf] }
  0xba   :  { %1557 = vmatpush.bf16.msrb.mxu1 %v2703_v22  ;;  %v3231_v20 = vor.u32 %v3735_v6, %v3230_v1  ;;  %v2911_v22 = vor.u32 %v3653_v12, %v2908_v13  ;;  %v3191_v1 = vor.u32 %v3725_v62, %v3190_v61  ;;  %v3183_v12 = vor.u32 %v3723_v4, %v3182_v3  ;;  %v3232_v17 = vld [vmem:[%s4489_s3 + $0x78] sm:$0xf0]  ;;  %v3763_v3 = vld [vmem:[%s4489_s3 + $0x154] sm:$0xf0]  ;;  %v3724_v4 = vld [vmem:[%s4489_s3 + $0x24] sm:$0xf] }
  0xbc   :  { %1570 = vmatpush.bf16.msrb.mxu3 %v2831_v7  ;;  %v3685_v7 = vld [vmem:[#allocation2 + $0x50c] sm:$0xf] }
  0xbd   :  { %1582 = vmatpush.bf16.msra.mxu2 %v2975_v55  ;;  %1595 = vmatpush.bf16.msrb.mxu0 %v3103_v27  ;;  %v3751_v55 = vld [vmem:[%s4489_s3 + $0xf4] sm:$0xf0]  ;;  %v1264_v27 = vadd.f32 %v3984_v19, %v262_v14  ;;  %v3039_v33 = vor.u32 %v3685_v7, %v3036_v25  ;;  %v3214_v19 = vld [vmem:[%s4489_s3 + $0x50] sm:$0xf]  ;;  %v3174_v14 = vld [vmem:[%s4489_s3] sm:$0xf] }
  0xbe   :  { %1558 = vmatpush.bf16.msrb.mxu1 %v2687_v37  ;;  %v3295_v26 = vor.u32 %v3751_v55, %v3294_v18  ;;  %v1341_v37 = vpop.f32.mrf.mxu2  ;;  %v3215_v42 = vor.u32 %v3731_v34, %v3214_v19  ;;  %v3238_v55 = vld [vmem:[%s4489_s3 + $0x80] sm:$0xf]  ;;  %v3748_v19 = vld [vmem:[%s4489_s3 + $0xe4] sm:$0xf]  ;;  %v3288_v34 = vld [vmem:[%s4489_s3 + $0xe8] sm:$0xf0] }
  0xbf   :  { %v1277_v39 = vadd.f32 %v3986_v28, %v1264_v27  ;;  %v3729_v28 = vld [vmem:[%s4489_s3 + $0x44] sm:$0xf0]  ;;  %v3224_v27 = vld [vmem:[%s4489_s3 + $0x68] sm:$0xf0] }
  0xc0   :  { %1571 = vmatpush.bf16.msrb.mxu3 %v2815_v40  ;;  %v3747_v40 = vld [vmem:[%s4489_s3 + $0xd4] sm:$0xf0] }
  0xc1   :  { %1583 = vmatpush.bf16.msra.mxu2 %v2959_v32  ;;  %1596 = vmatpush.bf16.msrb.mxu0 %v3087_v44  ;;  %v3223_v32 = vor.u32 %v3733_v24, %v3222_v23  ;;  %v1290_v44 = vadd.f32 %v3988_v36, %v1277_v39  ;;  %v3727_v36 = vld [vmem:[%s4489_s3 + $0x34] sm:$0xf0]  ;;  %v3296_v23 = vld [vmem:[%s4489_s3 + $0xf8] sm:$0xf0]  ;;  %v3730_v39 = vld [vmem:[%s4489_s3 + $0x54] sm:$0xf] }
  0xc2   :  { %1559 = vmatpush.bf16.msrb.mxu1 %v2671_v54 }
  0xc3   :  { %v1303_v56 = vadd.f32 %v3990_v41, %v1290_v44  ;;  %v3767_v44 = vld [vmem:[%s4489_s3 + $0x174] sm:$0xf0] }
  0xc4   :  { %1572 = vmatpush.bf16.msrb.mxu3 %v2799_v60 }
  0xc5   :  { %1584 = vmatpush.bf16.msra.mxu2 %v2943_v49  ;;  %1597 = vmatpush.bf16.msrb.mxu0 %v3071_v0  ;;  %v1315_v48 = vpop.f32.mrf.mxu0  ;;  %v3198_v49 = vld [vmem:[%s4489_s3 + $0x30] sm:$0xf]  ;;  %v3741_v0 = vld [vmem:[%s4489_s3 + $0xa4] sm:$0xf0] }
  0xc6   :  { %1560 = vmatpush.bf16.msrb.mxu1 %v2655_v11  ;;  %v1343_v52 = vpop.f32.mrf.mxu2  ;;  %v3199_v59 = vor.u32 %v3727_v36, %v3198_v49  ;;  %v1316_v60 = vadd.f32 %v1315_v48, %v1303_v56  ;;  %v3255_v9 = vor.u32 %v3741_v0, %v3254_v63  ;;  %v3246_v11 = vld [vmem:[%s4489_s3 + $0x90] sm:$0xf]  ;;  %v3208_v48 = vld [vmem:[%s4489_s3 + $0x48] sm:$0xf0]  ;;  %v3726_v56 = vld [vmem:[%s4489_s3 + $0x34] sm:$0xf] }
  0xc7   :  { %v3272_v52 = vld [vmem:[%s4489_s3 + $0xc8] sm:$0xf0]  ;;  %v3742_v63 = vld [vmem:[%s4489_s3 + $0xb4] sm:$0xf]  ;;  %v3264_v0 = vld [vmem:[%s4489_s3 + $0xb8] sm:$0xf0] }
  0xc8   :  { %1573 = vmatpush.bf16.msrb.mxu3 %v2783_v15  ;;  %v1328_v50 = vpop.f32.mrf.mxu1  ;;  %v3721_v15 = vld [vmem:[%s4489_s3 + $0x4] sm:$0xf0] }
  0xc9   :  { %1585 = vmatpush.bf16.msra.mxu2 %v2927_v5  ;;  %1598 = vmatpush.bf16.msrb.mxu0 %v3055_v21  ;;  %v1329_v2 = vadd.f32 %v1328_v50, %v1316_v60  ;;  %v3175_v21 = vor.u32 %v3721_v15, %v3174_v14  ;;  %v3744_v50 = vld [vmem:[%s4489_s3 + $0xc4] sm:$0xf]  ;;  %v3184_v14 = vld [vmem:[%s4489_s3 + $0x18] sm:$0xf0]  ;;  %v3334_v15 = vld [vmem:[%s4489_s3 + $0x140] sm:$0xf] }
  0xca   :  { %1612 = vmatpush.bf16.msra.mxu1 %v3167_v16  ;;  %v3734_v16 = vld [vmem:[%s4489_s3 + $0x74] sm:$0xf]  ;;  %v3275_v61 = vor.u32 %v3744_v50, %v3272_v52  ;;  %v3753_v50 = vld [vmem:[%s4489_s3 + $0x104] sm:$0xf0] }
  0xcb   :  { %1561 = vmatmul.bf16.vlgmr.msrb.gmra.mxu1 %v3932_v51  ;;  %1574 = vmatmul.bf16.vlgmr.msrb.gmra.mxu3 %v3936_v57  ;;  %v3278_v51 = vld [vmem:[%s4489_s3 + $0xd0] sm:$0xf]  ;;  %v3206_v57 = vld [vmem:[%s4489_s3 + $0x40] sm:$0xf]  ;;  %v1342_v13 = vadd.f32 %v1341_v37, %v1329_v2  ;;  %v3235_v7 = vor.u32 %v3734_v16, %v3232_v17  ;;  %v3761_v16 = vld [vmem:[%s4489_s3 + $0x144] sm:$0xf0] }
  0xcc   :  { %2016 = vmatpush.bf16.msra.mxu3 %v3231_v20  ;;  %v3279_v43 = vor.u32 %v3747_v40, %v3278_v51  ;;  %v3207_v47 = vor.u32 %v3729_v28, %v3206_v57  ;;  %v3737_v20 = vld [vmem:[%s4489_s3 + $0x84] sm:$0xf0]  ;;  %v3216_v51 = vld [vmem:[%s4489_s3 + $0x58] sm:$0xf0]  ;;  %v3291_v40 = vor.u32 %v3748_v19, %v3288_v34  ;;  %v3746_v28 = vld [vmem:[%s4489_s3 + $0xd4] sm:$0xf] }
  0xcd   :  { %1586 = vmatpush.bf16.msra.mxu2 %v2911_v22  ;;  %1599 = vmatpush.bf16.msrb.mxu0 %v3039_v33  ;;  %v1317_v5 = vpop.f32.mrf.mxu0  ;;  %v3750_v22 = vld [vmem:[%s4489_s3 + $0xf4] sm:$0xf]  ;;  %v1618_v24 = vmax.f32 %v1342_v13, 0.0  ;;  %v3239_v29 = vor.u32 %v3737_v20, %v3238_v55  ;;  %v263_v33 = vperm.slane %v3995_v53, 1  ;;  %v3342_v2 = vld [vmem:[%s4489_s3 + $0x150] sm:$0xf]  ;;  %v3335_v20 = vor.u32 %v3761_v16, %v3334_v15 }
  0xce   :  { %2029 = vmatpush.bf16.msrb.mxu1 %v3295_v26  ;;  %v1354_v6 = vpop.f32.mrf.mxu3  ;;  %v3732_v26 = vld [vmem:[%s4489_s3 + $0x64] sm:$0xf]  ;;  %v3192_v5 = vld [vmem:[%s4489_s3 + $0x28] sm:$0xf0]  ;;  %v3722_v13 = vld [vmem:[%s4489_s3 + $0x14] sm:$0xf] }
  0xcf   :  { %v4129_v37 = vpack.c.bf16 %v1618_v24, %v1618_v24  ;;  %v1355_v57 = vadd.f32 %v1354_v6, %v263_v33  ;;  %v3343_v6 = vor.u32 %v3763_v3, %v3342_v2  ;;  %v3248_v24 = vld [vmem:[%s4489_s3 + $0x98] sm:$0xf0]  ;;  %v3757_v33 = vld [vmem:[%s4489_s3 + $0x124] sm:$0xf0]  ;;  %v3758_v15 = vld [vmem:[%s4489_s3 + $0x134] sm:$0xf] }
  0xd0   :  { %2017 = vmatpush.bf16.msra.mxu3 %v3223_v32  ;;  %1587 = vmatmul.bf16.vlgmr.msra.gmra.mxu2 %v3960_v30  ;;  %v3745_v30 = vld [vmem:[%s4489_s3 + $0xc4] sm:$0xf0]  ;;  %v1330_v8 = vpop.f32.mrf.mxu1  ;;  %v3299_v32 = vor.u32 %v3750_v22, %v3296_v23  ;;  %v3738_v23 = vld [vmem:[%s4489_s3 + $0x94] sm:$0xf]  ;;  %v3344_v3 = vld [vmem:[%s4489_s3 + $0x158] sm:$0xf0] }
  0xd1   :  { %1600 = vmatmul.bf16.vlgmr.msrb.gmra.mxu0 %v3962_v35  ;;  %v3271_v54 = vor.u32 %v3745_v30, %v3270_v46  ;;  %v3262_v35 = vld [vmem:[%s4489_s3 + $0xb0] sm:$0xf]  ;;  %v3219_v46 = vor.u32 %v3730_v39, %v3216_v51  ;;  %v3251_v34 = vor.u32 %v3738_v23, %v3248_v24  ;;  %v3736_v39 = vld [vmem:[%s4489_s3 + $0x84] sm:$0xf]  ;;  %v3240_v51 = vld [vmem:[%s4489_s3 + $0x88] sm:$0xf0] }
  0xd2   :  { %2030 = vmatpush.bf16.msrb.mxu1 %v3287_v38  ;;  %v3263_v41 = vor.u32 %v3743_v58, %v3262_v35  ;;  %v3227_v38 = vor.u32 %v3732_v26, %v3224_v27  ;;  %v3200_v35 = vld [vmem:[%s4489_s3 + $0x38] sm:$0xf0]  ;;  %v3350_v58 = vld [vmem:[%s4489_s3 + $0x160] sm:$0xf]  ;;  %v3326_v26 = vld [vmem:[%s4489_s3 + $0x130] sm:$0xf] }
  0xd3   :  { %v1367_v10 = vpop.f32.mrf.mxu2  ;;  %v3759_v27 = vld [vmem:[%s4489_s3 + $0x134] sm:$0xf0]  ;;  %v3756_v24 = vld [vmem:[%s4489_s3 + $0x124] sm:$0xf] }
  0xd4   :  { %2018 = vmatpush.bf16.msra.mxu3 %v3215_v42  ;;  %v3358_v42 = vld [vmem:[%s4489_s3 + $0x170] sm:$0xf]  ;;  %v1368_v36 = vadd.f32 %v1367_v10, %v1355_v57 }
  0xd5   :  { %v3359_v30 = vor.u32 %v3767_v44, %v3358_v42  ;;  %v3310_v57 = vld [vmem:[%s4489_s3 + $0x110] sm:$0xf] }
  0xd6   :  { %2031 = vmatpush.bf16.msrb.mxu1 %v3279_v43  ;;  %v1356_v25 = vpop.f32.mrf.mxu3  ;;  %v3280_v43 = vld [vmem:[%s4489_s3 + $0xd8] sm:$0xf0] }
  0xd7   :  { %v3283_v49 = vor.u32 %v3746_v28, %v3280_v43  ;;  %2042 = vmatpush.bf16.msrb.mxu2 %v3359_v30  ;;  %v3720_v25 = vld [vmem:[%s4489_s3 + $0x4] sm:$0xf]  ;;  %v3755_v28 = vld [vmem:[%s4489_s3 + $0x114] sm:$0xf0] }
  0xd8   :  { %2019 = vmatpush.bf16.msra.mxu3 %v3207_v47  ;;  %v3728_v47 = vld [vmem:[%s4489_s3 + $0x44] sm:$0xf] }
  0xda   :  { %2032 = vmatpush.bf16.msrb.mxu1 %v3271_v54  ;;  %v3211_v54 = vor.u32 %v3728_v47, %v3208_v48  ;;  %v3311_v48 = vor.u32 %v3755_v28, %v3310_v57  ;;  %v3304_v57 = vld [vmem:[%s4489_s3 + $0x108] sm:$0xf0] }
  0xdb   :  { %3171 = vmatmul.msk.bf16.vlgmr.msra.gmra.mxu1 %vm1250_vm0, %v3950_v45  ;;  %v3739_v45 = vld [vmem:[%s4489_s3 + $0x94] sm:$0xf0]  ;;  %v1369_v31 = vpop.f32.mrf.mxu2 }
  0xdc   :  { %2020 = vmatpush.bf16.msra.mxu3 %v3199_v59  ;;  %v3247_v18 = vor.u32 %v3739_v45, %v3246_v11  ;;  %v3765_v59 = vld [vmem:[%s4489_s3 + $0x164] sm:$0xf0]  ;;  %v3740_v11 = vld [vmem:[%s4489_s3 + $0xa4] sm:$0xf]  ;;  %v3256_v45 = vld [vmem:[%s4489_s3 + $0xa8] sm:$0xf0]  ;;  %v3327_v31 = vor.u32 %v3759_v27, %v3326_v26 }
  0xdd   :  { %v3351_v62 = vor.u32 %v3765_v59, %v3350_v58  ;;  %v3259_v55 = vor.u32 %v3740_v11, %v3256_v45  ;;  %v3360_v58 = vld [vmem:[%s4489_s3 + $0x178] sm:$0xf0]  ;;  %v3336_v11 = vld [vmem:[%s4489_s3 + $0x148] sm:$0xf0]  ;;  %v3390_v26 = vld [vmem:[%s4489_s3 + $0x1b0] sm:$0xf] }
  0xde   :  { %2033 = vmatpush.bf16.msrb.mxu1 %v3263_v41  ;;  %v3775_v27 = vld [vmem:[%s4489_s3 + $0x1b4] sm:$0xf0] }
  0xdf   :  { %2043 = vmatpush.bf16.msrb.mxu2 %v3351_v62 }
  0xe0   :  { %2021 = vmatpush.bf16.msra.mxu3 %v3191_v1  ;;  %v3203_v1 = vor.u32 %v3726_v56, %v3200_v35  ;;  %v3766_v35 = vld [vmem:[%s4489_s3 + $0x174] sm:$0xf] }
  0xe1   :  { %v3363_v59 = vor.u32 %v3766_v35, %v3360_v58  ;;  %v3782_v35 = vld [vmem:[%s4489_s3 + $0x1f4] sm:$0xf]  ;;  %v3424_v58 = vld [vmem:[%s4489_s3 + $0x1f8] sm:$0xf0] }
  0xe2   :  { %2034 = vmatpush.bf16.msrb.mxu1 %v3255_v9  ;;  %v3267_v9 = vor.u32 %v3742_v63, %v3264_v0  ;;  %v3783_v63 = vld [vmem:[%s4489_s3 + $0x1f4] sm:$0xf0]  ;;  %v3762_v0 = vld [vmem:[%s4489_s3 + $0x154] sm:$0xf] }
  0xe3   :  { %2044 = vmatpush.bf16.msrb.mxu2 %v3343_v6  ;;  %v3781_v6 = vld [vmem:[%s4489_s3 + $0x1e4] sm:$0xf0] }
  0xe4   :  { %2022 = vmatpush.bf16.msra.mxu3 %v3183_v12  ;;  %v3195_v12 = vor.u32 %v3724_v4, %v3192_v5  ;;  %v3347_v4 = vor.u32 %v3762_v0, %v3344_v3  ;;  %v3414_v5 = vld [vmem:[%s4489_s3 + $0x1e0] sm:$0xf] }
  0xe5   :  { %v1380_v60 = vpop.f32.mrf.mxu0 }
  0xe6   :  { %2035 = vmatpush.bf16.msrb.mxu1 %v3247_v18  ;;  %v1381_v41 = vadd.f32 %v1380_v60, %v1368_v36  ;;  %v3302_v36 = vld [vmem:[%s4489_s3 + $0x100] sm:$0xf]  ;;  %v3764_v60 = vld [vmem:[%s4489_s3 + $0x164] sm:$0xf] }
  0xe7   :  { %2045 = vmatpush.bf16.msrb.mxu2 %v3335_v20 }
  0xe8   :  { %2023 = vmatpush.bf16.msra.mxu3 %v3175_v21  ;;  %v1393_v8 = vpop.f32.mrf.mxu1 }
  0xe9   :  { %v1394_v10 = vadd.f32 %v1393_v8, %v1381_v41  ;;  %v3422_v41 = vld [vmem:[%s4489_s3 + $0x1f0] sm:$0xf]  ;;  %v3760_v8 = vld [vmem:[%s4489_s3 + $0x144] sm:$0xf] }
  0xea   :  { %2036 = vmatpush.bf16.msrb.mxu1 %v3239_v29  ;;  %v3176_v29 = vld [vmem:[%s4489_s3 + $0x8] sm:$0xf0]  ;;  %v3423_v2 = vor.u32 %v3783_v63, %v3422_v41  ;;  %v3339_v45 = vor.u32 %v3760_v8, %v3336_v11  ;;  %v3780_v41 = vld [vmem:[%s4489_s3 + $0x1e4] sm:$0xf] }
  0xeb   :  { %2024 = vmatmul.bf16.vlgmr.msra.gmra.mxu3 %v4129_v37  ;;  %2046 = vmatpush.bf16.msrb.mxu2 %v3327_v31  ;;  %v3754_v31 = vld [vmem:[%s4489_s3 + $0x114] sm:$0xf]  ;;  %v3416_v63 = vld [vmem:[%s4489_s3 + $0x1e8] sm:$0xf0] }
  0xec   :  { %2068 = vmatpush.bf16.msrb.mxu3 %v3235_v7  ;;  %v3187_v7 = vor.u32 %v3722_v13, %v3184_v14  ;;  %2055 = vmatpush.bf16.msra.mxu0 %v3423_v2  ;;  %v3406_v13 = vld [vmem:[%s4489_s3 + $0x1d0] sm:$0xf]  ;;  %v3779_v14 = vld [vmem:[%s4489_s3 + $0x1d4] sm:$0xf0]  ;;  %v3419_v2 = vor.u32 %v3780_v41, %v3416_v63 }
  0xed   :  { %v1382_v17 = vpop.f32.mrf.mxu0  ;;  %v3791_v63 = vld [vmem:[%s4491_s5 + $0x38] sm:$0xff] }
  0xee   :  { %2081 = vmatpush.bf16.msra.mxu1 %v3299_v32  ;;  %v1406_v18 = vpop.f32.mrf.mxu3  ;;  %v3318_v32 = vld [vmem:[%s4489_s3 + $0x120] sm:$0xf] }
  0xef   :  { %v1407_v21 = vadd.f32 %v1406_v18, %v1394_v10  ;;  %v3319_v42 = vor.u32 %v3757_v33, %v3318_v32  ;;  %v3415_v10 = vor.u32 %v3781_v6, %v3414_v5  ;;  %v3407_v18 = vor.u32 %v3779_v14, %v3406_v13  ;;  %v3312_v32 = vld [vmem:[%s4489_s3 + $0x118] sm:$0xf0]  ;;  %v3778_v5 = vld [vmem:[%s4489_s3 + $0x1d4] sm:$0xf]  ;;  %v3400_v13 = vld [vmem:[%s4489_s3 + $0x1c8] sm:$0xf0] }
  0xf0   :  { %2069 = vmatpush.bf16.msrb.mxu3 %v3227_v38  ;;  %v1395_v19 = vpop.f32.mrf.mxu1  ;;  %v264_v33 = vperm.slane %v3995_v53, 2  ;;  %v3408_v6 = vld [vmem:[%s4489_s3 + $0x1d8] sm:$0xf0] }
  0xf1   :  { %2047 = vmatpush.bf16.msrb.mxu2 %v3319_v42  ;;  %2056 = vmatpush.bf16.msra.mxu0 %v3415_v10  ;;  %v3391_v19 = vor.u32 %v3775_v27, %v3390_v26  ;;  %v3752_v42 = vld [vmem:[%s4489_s3 + $0x104] sm:$0xf] }
  0xf2   :  { %2082 = vmatpush.bf16.msra.mxu1 %v3291_v40  ;;  %v3179_v40 = vor.u32 %v3720_v25, %v3176_v29 }
  0xf3   :  { %v1419_v22 = vpop.f32.mrf.mxu2 }
  0xf4   :  { %2070 = vmatpush.bf16.msrb.mxu3 %v3219_v46  ;;  %v1420_v38 = vadd.f32 %v1419_v22, %v1407_v21  ;;  %v3243_v46 = vor.u32 %v3736_v39, %v3240_v51  ;;  %v3398_v21 = vld [vmem:[%s4489_s3 + $0x1c0] sm:$0xf]  ;;  %v3777_v22 = vld [vmem:[%s4489_s3 + $0x1c4] sm:$0xf0] }
  0xf5   :  { %v1432_v43 = vpop.f32.mrf.mxu0  ;;  %2048 = vmatpush.bf16.msrb.mxu2 %v3311_v48  ;;  %2057 = vmatpush.bf16.msra.mxu0 %v3407_v18  ;;  %v3399_v23 = vor.u32 %v3777_v22, %v3398_v21  ;;  %v3382_v39 = vld [vmem:[%s4489_s3 + $0x1a0] sm:$0xf]  ;;  %v3773_v51 = vld [vmem:[%s4489_s3 + $0x1a4] sm:$0xf0]  ;;  %v3771_v48 = vld [vmem:[%s4489_s3 + $0x194] sm:$0xf0] }
  0xf6   :  { %2083 = vmatpush.bf16.msra.mxu1 %v3283_v49  ;;  %v1408_v44 = vpop.f32.mrf.mxu3  ;;  %v1433_v30 = vadd.f32 %v1432_v43, %v1420_v38  ;;  %v3315_v38 = vor.u32 %v3754_v31, %v3312_v32  ;;  %v3383_v43 = vor.u32 %v3773_v51, %v3382_v39  ;;  %v265_v22 = vperm.slane %v3995_v53, 3  ;;  %v3368_v53 = vld [vmem:[%s4489_s3 + $0x188] sm:$0xf0] }
  0xf7   :  { %v3307_v44 = vor.u32 %v3752_v42, %v3304_v57 }
  0xf8   :  { %2071 = vmatpush.bf16.msrb.mxu3 %v3211_v54  ;;  %v1619_v49 = vmax.f32 %v1433_v30, 0.0  ;;  %v3303_v54 = vor.u32 %v3753_v50, %v3302_v36 }
  0xf9   :  { %2058 = vmatpush.bf16.msra.mxu0 %v3399_v23  ;;  %v3770_v23 = vld [vmem:[%s4489_s3 + $0x194] sm:$0xf] }
  0xfa   :  { %2084 = vmatpush.bf16.msra.mxu1 %v3275_v61  ;;  %v1623_v52 = vpack.c.bf16 %v1619_v49, %v1619_v49  ;;  %2049 = vmatpush.bf16.msrb.mxu2 %v3303_v54  ;;  %v3769_v54 = vld [vmem:[%s4489_s3 + $0x184] sm:$0xf0] }
  0xfb   :  { %v1421_v47 = vpop.f32.mrf.mxu2 }
  0xfc   :  { %2072 = vmatpush.bf16.msrb.mxu3 %v3203_v1  ;;  %2037 = vmatmul.bf16.vlgmr.msrb.gmra.mxu1 %v1623_v52  ;;  %v3374_v47 = vld [vmem:[%s4489_s3 + $0x190] sm:$0xf] }
  0xfd   :  { %v1434_v56 = vpop.f32.mrf.mxu0  ;;  %2059 = vmatpush.bf16.msra.mxu0 %v3391_v19  ;;  %v3375_v49 = vor.u32 %v3771_v48, %v3374_v47 }
  0xfe   :  { %2085 = vmatpush.bf16.msra.mxu1 %v3267_v9  ;;  %2094 = vmatpush.bf16.msra.mxu2 %v3363_v59 }
 0x100   :  { %2073 = vmatpush.bf16.msrb.mxu3 %v3195_v12 }
 0x101   :  { %2060 = vmatpush.bf16.msra.mxu0 %v3383_v43 }
 0x102   :  { %2086 = vmatpush.bf16.msra.mxu1 %v3259_v55  ;;  %v3328_v55 = vld [vmem:[%s4489_s3 + $0x138] sm:$0xf0] }
 0x103   :  { %v3331_v20 = vor.u32 %v3758_v15, %v3328_v55  ;;  %v3772_v55 = vld [vmem:[%s4489_s3 + $0x1a4] sm:$0xf] }
 0x104   :  { %2074 = vmatpush.bf16.msrb.mxu3 %v3187_v7  ;;  %v3320_v7 = vld [vmem:[%s4489_s3 + $0x128] sm:$0xf0] }
 0x105   :  { %v3323_v25 = vor.u32 %v3756_v24, %v3320_v7  ;;  %2061 = vmatpush.bf16.msra.mxu0 %v3375_v49  ;;  %v3376_v24 = vld [vmem:[%s4489_s3 + $0x198] sm:$0xf0] }
 0x106   :  { %2087 = vmatpush.bf16.msra.mxu1 %v3251_v34  ;;  %v3379_v7 = vor.u32 %v3770_v23, %v3376_v24 }
 0x108   :  { %2075 = vmatpush.bf16.msrb.mxu3 %v3179_v40  ;;  %v1445_v1 = vpop.f32.mrf.mxu1 }
 0x109   :  { %v4265_v62 = vpop.f32.mrf.mxu0  ;;  %v1446_v28 = vadd.f32 %v1445_v1, %v264_v33 }
 0x10a   :  { %2088 = vmatpush.bf16.msra.mxu1 %v3243_v46 }
 0x10b   :  { %2076 = vmatmul.bf16.vlgmr.msrb.gmra.mxu3 %v4129_v37  ;;  %v3352_v37 = vld [vmem:[%s4489_s3 + $0x168] sm:$0xf0] }
 0x10c   :  { %v3355_v61 = vor.u32 %v3764_v60, %v3352_v37  ;;  %v3427_v60 = vor.u32 %v3782_v35, %v3424_v58  ;;  %2256 = vmatpush.bf16.msra.mxu3 %v3791_v63 }
 0x10d   :  { %2089 = vmatmul.bf16.vlgmr.msra.gmra.mxu1 %v1623_v52  ;;  %v3366_v52 = vld [vmem:[%s4489_s3 + $0x180] sm:$0xf] }
 0x10e   :  { %2095 = vmatpush.bf16.msra.mxu2 %v3355_v61  ;;  %v1458_v9 = vpop.f32.mrf.mxu3  ;;  %v3367_v56 = vor.u32 %v3769_v54, %v3366_v52 }
 0x10f   :  { %v1459_v46 = vadd.f32 %v1458_v9, %v1446_v28  ;;  %v3411_v9 = vor.u32 %v3778_v5, %v3408_v6  ;;  %v3786_v5 = vld [vmem:[%s4491_s5 + $0x10] sm:$0xff] }
 0x110   :  { %v1447_v17 = vpop.f32.mrf.mxu1  ;;  %2062 = vmatpush.bf16.msra.mxu0 %v3367_v56  ;;  %v3798_v6 = vld [vmem:[%s4491_s5 + $0x70] sm:$0xff] }
 0x111   :  { %v1473_v12 = vpop.f32.mrf.mxu0  ;;  %v1472_v36 = vadd.f32 %v4265_v62, %v1459_v46  ;;  %v3392_v17 = vld [vmem:[%s4489_s3 + $0x1b8] sm:$0xf0] }
 0x112   :  { %2096 = vmatpush.bf16.msra.mxu2 %v3347_v4  ;;  %v3776_v12 = vld [vmem:[%s4489_s3 + $0x1c4] sm:$0xf] }
 0x113   :  { %v1484_v16 = vpop.f32.mrf.mxu2  ;;  %v3403_v14 = vor.u32 %v3776_v12, %v3400_v13  ;;  %v3795_v12 = vld [vmem:[%s4491_s5 + $0x58] sm:$0xff]  ;;  %v3794_v13 = vld [vmem:[%s4491_s5 + $0x50] sm:$0xff] }
 0x114   :  { %v1485_v59 = vadd.f32 %v1484_v16, %v1472_v36  ;;  %2107 = vmatpush.bf16.msrb.mxu0 %v3427_v60  ;;  %v3774_v16 = vld [vmem:[%s4489_s3 + $0x1b4] sm:$0xf]  ;;  %v1690_v36 = vld [vmem:[%s4490_s4] sm:$0x3] }
 0x115   :  { %v3395_v18 = vor.u32 %v3774_v16, %v3392_v17  ;;  %v3792_v17 = vld [vmem:[%s4491_s5 + $0x40] sm:$0xff] }
 0x116   :  { %2097 = vmatpush.bf16.msra.mxu2 %v3339_v45  ;;  %v1460_v29 = vpop.f32.mrf.mxu3 }
 0x117   :  { %v3768_v29 = vld [vmem:[%s4489_s3 + $0x184] sm:$0xf] }
 0x118   :  { %2108 = vmatpush.bf16.msrb.mxu0 %v3419_v2  ;;  %v3371_v31 = vor.u32 %v3768_v29, %v3368_v53  ;;  %v3788_v2 = vld [vmem:[%s4491_s5 + $0x20] sm:$0xff] }
 0x119   :  { %v1523_v34 = vpop.f32.mrf.mxu0 }
 0x11a   :  { %2098 = vmatpush.bf16.msra.mxu2 %v3331_v20  ;;  %v3384_v20 = vld [vmem:[%s4489_s3 + $0x1a8] sm:$0xf0] }
 0x11b   :  { %v1486_v40 = vpop.f32.mrf.mxu2  ;;  %v3387_v21 = vor.u32 %v3772_v55, %v3384_v20  ;;  %v3806_v20 = vld [vmem:[%s4493_s7 + $0x30] sm:$0xff] }
 0x11c   :  { %2109 = vmatpush.bf16.msrb.mxu0 %v3411_v9  ;;  %v3797_v9 = vld [vmem:[%s4491_s5 + $0x68] sm:$0xff] }
 0x11e   :  { %2099 = vmatpush.bf16.msra.mxu2 %v3323_v25 }
 0x120   :  { %2110 = vmatpush.bf16.msrb.mxu0 %v3403_v14 }
 0x121   :  { %v1525_v30 = vpop.f32.mrf.mxu0 }
 0x122   :  { %2100 = vmatpush.bf16.msra.mxu2 %v3315_v38 }
 0x124   :  { %2111 = vmatpush.bf16.msrb.mxu0 %v3395_v18  ;;  %v3807_v18 = vld [vmem:[%s4493_s7 + $0x38] sm:$0xff] }
 0x126   :  { %2101 = vmatpush.bf16.msra.mxu2 %v3307_v44 }
 0x128   :  { %v1497_v50 = vpop.f32.mrf.mxu1  ;;  %2112 = vmatpush.bf16.msrb.mxu0 %v3387_v21  ;;  %v3805_v21 = vld [vmem:[%s4493_s7 + $0x28] sm:$0xff] }
 0x129   :  { %v1498_v37 = vadd.f32 %v1497_v50, %v1485_v59  ;;  %v1692_v50 = vperm.slane %v1690_v36, 0  ;;  %v1693_v59 = vperm.slane %v1690_v36, 1 }
 0x12c   :  { %2113 = vmatpush.bf16.msrb.mxu0 %v3379_v7  ;;  %v3804_v7 = vld [vmem:[%s4493_s7 + $0x20] sm:$0xff] }
 0x12e   :  { %v1510_v62 = vpop.f32.mrf.mxu3 }
 0x12f   :  { %v1549_v61 = vpop.f32.mrf.mxu0  ;;  %v1511_v0 = vadd.f32 %v1510_v62, %v1498_v37 }
 0x130   :  { %v1499_v1 = vpop.f32.mrf.mxu1  ;;  %2114 = vmatpush.bf16.msrb.mxu0 %v3371_v31 }
 0x131   :  { %v1524_v3 = vadd.f32 %v1523_v34, %v1511_v0  ;;  %v3790_v0 = vld [vmem:[%s4491_s5 + $0x30] sm:$0xff]  ;;  %v3789_v1 = vld [vmem:[%s4491_s5 + $0x28] sm:$0xff] }
 0x132   :  { %2257 = vmatpush.bf16.msra.mxu3 %v3790_v0 }
 0x133   :  { %v1536_v4 = vpop.f32.mrf.mxu2  ;;  %v1620_v8 = vmax.f32 %v1524_v3, 0.0  ;;  %v3799_v3 = vld [vmem:[%s4491_s5 + $0x78] sm:$0xff] }
 0x134   :  { %v1537_v25 = vadd.f32 %v1536_v4, %v265_v22  ;;  %v3787_v4 = vld [vmem:[%s4491_s5 + $0x18] sm:$0xff]  ;;  %2269 = vmatpush.bf16.msrb.mxu1 %v3799_v3 }
 0x135   :  { %v1624_v10 = vpack.c.bf16 %v1620_v8, %v1620_v8  ;;  %v3785_v8 = vld [vmem:[%s4491_s5 + $0x8] sm:$0xff] }
 0x136   :  { %v1512_v45 = vpop.f32.mrf.mxu3  ;;  %v1550_v27 = vadd.f32 %v1549_v61, %v1537_v25  ;;  %2258 = vmatpush.bf16.msra.mxu3 %v3789_v1 }
 0x137   :  { %v1551_v11 = vpop.f32.mrf.mxu0  ;;  %2050 = vmatmul.bf16.vlgmr.msrb.gmra.mxu2 %v1624_v10  ;;  %v3796_v45 = vld [vmem:[%s4491_s5 + $0x60] sm:$0xff] }
 0x138   :  { %2270 = vmatpush.bf16.msrb.mxu1 %v3798_v6  ;;  %v3784_v11 = vld [vmem:[%s4491_s5] sm:$0xff]  ;;  %2352 = vmatpush.bf16.msrb.mxu2 %v3807_v18 }
 0x13a   :  { %2259 = vmatpush.bf16.msra.mxu3 %v3788_v2 }
 0x13b   :  { %v1538_v15 = vpop.f32.mrf.mxu2 }
 0x13c   :  { %2271 = vmatpush.bf16.msrb.mxu1 %v3797_v9  ;;  %v3793_v15 = vld [vmem:[%s4491_s5 + $0x48] sm:$0xff]  ;;  %2353 = vmatpush.bf16.msrb.mxu2 %v3806_v20 }
 0x13e   :  { %2260 = vmatpush.bf16.msra.mxu3 %v3787_v4 }
 0x140   :  { %2272 = vmatpush.bf16.msrb.mxu1 %v3796_v45  ;;  %2354 = vmatpush.bf16.msrb.mxu2 %v3805_v21 }
 0x142   :  { %2261 = vmatpush.bf16.msra.mxu3 %v3786_v5 }
 0x144   :  { %2273 = vmatpush.bf16.msrb.mxu1 %v3795_v12  ;;  %2355 = vmatpush.bf16.msrb.mxu2 %v3804_v7 }
 0x146   :  { %2262 = vmatpush.bf16.msra.mxu3 %v3785_v8 }
 0x147   :  { %2102 = vmatmul.bf16.vlgmr.msra.gmra.mxu2 %v1624_v10 }
 0x148   :  { %v1562_v26 = vpop.f32.mrf.mxu1  ;;  %2274 = vmatpush.bf16.msrb.mxu1 %v3794_v13 }
 0x149   :  { %v1563_v32 = vadd.f32 %v1562_v26, %v1550_v27 }
 0x14a   :  { %2263 = vmatpush.bf16.msra.mxu3 %v3784_v11 }
 0x14c   :  { %2275 = vmatpush.bf16.msrb.mxu1 %v3793_v15 }
 0x14e   :  { %v1575_v33 = vpop.f32.mrf.mxu3  ;;  %v1601_v19 = vpop.f32.mrf.mxu0 }
 0x14f   :  { %v1576_v34 = vadd.f32 %v1575_v33, %v1563_v32 }
 0x150   :  { %v1564_v38 = vpop.f32.mrf.mxu1  ;;  %2276 = vmatpush.bf16.msrb.mxu1 %v3792_v17 }
 0x151   :  { %v3802_v38 = vld [vmem:[%s4493_s7 + $0x10] sm:$0xff] }
 0x153   :  { %v1588_v39 = vpop.f32.mrf.mxu2 }
 0x154   :  { %v1589_v51 = vadd.f32 %v1588_v39, %v1576_v34  ;;  %v3803_v34 = vld [vmem:[%s4493_s7 + $0x18] sm:$0xff]  ;;  %v3801_v39 = vld [vmem:[%s4493_s7 + $0x8] sm:$0xff] }
 0x155   :  { %2356 = vmatpush.bf16.msrb.mxu2 %v3803_v34 }
 0x156   :  { %v1577_v40 = vpop.f32.mrf.mxu3  ;;  %v1603_v42 = vpop.f32.mrf.mxu0  ;;  %v1602_v57 = vadd.f32 %v1601_v19, %v1589_v51  ;;  %v3800_v51 = vld [vmem:[%s4493_s7] sm:$0xff]  ;;  %s2372_s7 = sshll.u32 %s3869_s23, 4  ;;  %s2373_s7 = int_to_ptr.vmem [resolvable:$true] %s2372_s7 }
 0x157   :  { %v3812_v42 = vld [vmem:[%s4492_s6] ss:$0 sm:$0xff] }
 0x158   :  { %v1614_v28 = vpop.f32.mrf.mxu1 }
 0x159   :  { %v1615_v43 = vadd.f32 %v1614_v28, %v1602_v57  ;;  %2357 = vmatpush.bf16.msrb.mxu2 %v3802_v38 }
 0x15b   :  { %v1590_v44 = vpop.f32.mrf.mxu2  ;;  %v1621_v46 = vmax.f32 %v1615_v43, 0.0 }
 0x15d   :  { %v1625_v30 = vpack.c.bf16 %v1621_v46, %v1621_v46  ;;  %2358 = vmatpush.bf16.msrb.mxu2 %v3801_v39 }
 0x15f   :  { %2063 = vmatmul.bf16.vlgmr.msra.gmra.mxu0 %v1625_v30 }
 0x160   :  { %v1616_v47 = vpop.f32.mrf.mxu1 }
 0x161   :  { %2359 = vmatpush.bf16.msrb.mxu2 %v3800_v51 }
 0x16e   :  { %v2025_v48 = vpop.f32.mrf.mxu3 }
 0x16f   :  { %2115 = vmatmul.bf16.vlgmr.msrb.gmra.mxu0 %v1625_v30  ;;  %v2026_v52 = vadd.f32 %v2025_v48, %v1692_v50  ;;  %v3813_v48 = vld [vmem:[%s4494_s8] ss:$0 sm:$0xff] }
 0x176   :  { %v2027_v49 = vpop.f32.mrf.mxu3 }
 0x179   :  { %v2038_v54 = vpop.f32.mrf.mxu1 }
 0x17a   :  { %v2039_v56 = vadd.f32 %v2038_v54, %v2026_v52 }
 0x181   :  { %v2040_v58 = vpop.f32.mrf.mxu1 }
 0x18a   :  { %v2090_v61 = vpop.f32.mrf.mxu1 }
 0x18e   :  { %v2077_v35 = vpop.f32.mrf.mxu3 }
 0x18f   :  { %v2078_v37 = vadd.f32 %v2077_v35, %v1693_v59 }
 0x191   :  { %v2091_v62 = vadd.f32 %v2090_v61, %v2078_v37 }
 0x192   :  { %v2092_v41 = vpop.f32.mrf.mxu1 }
 0x196   :  { %v2079_v60 = vpop.f32.mrf.mxu3 }
 0x1ba   :  { %v2051_v10 = vpop.f32.mrf.mxu2 }
 0x1bb   :  { %v2052_v22 = vadd.f32 %v2051_v10, %v2039_v56 }
 0x1c2   :  { %v2053_v14 = vpop.f32.mrf.mxu2 }
 0x1ca   :  { %v2103_v16 = vpop.f32.mrf.mxu2 }
 0x1cb   :  { %v2104_v29 = vadd.f32 %v2103_v16, %v2091_v62 }
 0x1d2   :  { %v2105_v55 = vpop.f32.mrf.mxu2 }
 0x1dc   :  { %v2064_v23 = vpop.f32.mrf.mxu0 }
 0x1dd   :  { %v2065_v24 = vadd.f32 %v2064_v23, %v2052_v22 }
 0x1df   :  { %v2120_v25 = vmax.f32 %v2065_v24, 0.0 }
 0x1e1   :  { %v2122_v26 = vpack.c.bf16 %v2120_v25, %v2120_v25 }
 0x1e3   :  { %2264 = vmatmul.bf16.vlgmr.msra.gmra.mxu3 %v2122_v26 }
 0x1e4   :  { %v2066_v27 = vpop.f32.mrf.mxu0 }
 0x1ec   :  { %v2116_v53 = vpop.f32.mrf.mxu0 }
 0x1ed   :  { %v2117_v31 = vadd.f32 %v2116_v53, %v2104_v29 }
 0x1ef   :  { %v2121_v32 = vmax.f32 %v2117_v31, 0.0 }
 0x1f1   :  { %v2123_v33 = vpack.c.bf16 %v2121_v32, %v2121_v32 }
 0x1f3   :  { %2277 = vmatmul.bf16.vlgmr.msrb.gmra.mxu1 %v2123_v33 }
 0x1f4   :  { %v2118_v19 = vpop.f32.mrf.mxu0 }
 0x266   :  { %v2265_v40 = vpop.f32.mrf.mxu3 }
 0x267   :  { %v2266_v28 = vadd.f32 %v3812_v42, %v2265_v40 }
 0x26e   :  { %v2267_v57 = vpop.f32.mrf.mxu3 }
 0x270   :  { %v2278_v43 = vpop.f32.mrf.mxu1 }
 0x271   :  { %v2279_v44 = vadd.f32 %v2278_v43, %v2266_v28 }
 0x273   :  { %v2282_v46 = vmax.f32 %v2279_v44, 0.0 }
 0x275   :  { %v2283_v30 = vpack.c.bf16 %v2282_v46, %v2282_v46 }
 0x277   :  { %2360 = vmatmul.bf16.vlgmr.msrb.gmra.mxu2 %v2283_v30 }
 0x278   :  { %v2280_v47 = vpop.f32.mrf.mxu1 }
 0x2fa   :  { %v2361_v49 = vpop.f32.mrf.mxu2 }
 0x2fb   :  { %v2362_v36 = vadd.f32 %v3813_v48, %v2361_v49 }
 0x2fd   :  { %2366 = vst.msk [vmem:[#allocation5] sm:$0xff] %vm2365_vm1, %v2362_v36 }
 0x2fe   :  { %2377 = dma.vmem_to_hbm [thread:$0]  %s2373_s7, 128, %s2375_s26, [#allocation4]  }
 0x302   :  { %v2363_v50 = vpop.f32.mrf.mxu2 }
 0x303   :  { %3864 = dma.done.wait [#allocation4], 128  }
 0x304   :  { %3865 = vsyncadd [#allocation4], 4294967168 }
 0x305   :  { %2382 = vsyncpa [#allocation3], 1 }
 0x306   :  { %2383 = vsyncpa [#allocation4], 1 }

</bundles_post_ra>
